<compile_context>
chip_gen: v7x
topology: tpu7x:2x2x1
jax: 0.10.0
libtpu: 0.0.40
codegen_flags: <defaults>
</compile_context>

<pallas_src>
import functools

import jax
import jax.numpy as jnp
from jax.experimental import pallas as pl
from jax.experimental.pallas import tpu as pltpu

NUM_HEADS = 8
LN_EPS = 1e-5
N_CLASSES = 2
OUT_PAD = 128          # fc3 output padded to a lane-dense width


# ----------------------------- kernels ------------------------------------ #

def _qkv_kernel(x_ref, w_ref, b_ref, qkv_ref):
    # x: [B*L, D] @ w: [D, 3D] + b: [1, 3D]  ->  qkv: [B*L, 3D]
    qkv_ref[...] = (
        jnp.dot(x_ref[...], w_ref[...], preferred_element_type=jnp.float32)
        + b_ref[...]
    )


def _attn_block_kernel(qh_ref, kh_ref, vh_ref, xp_ref,
                       wo3_ref, bo_ref, g_ref, beta_ref,
                       w1_ref, b1_ref, w2_ref, b2_ref, w3_ref, b3_ref,
                       out_ref, *, scale, num_heads, rows_per_group):
    # One batch element per grid step.
    q = qh_ref[0]          # [H, L, dph]   (torch's contiguous head view)
    k = kh_ref[0]
    v = vh_ref[0]
    d_model = wo3_ref.shape[2]
    seq = rows_per_group * num_heads

    # ---- scaled dot-product attention, all heads batched ------------------ #
    s = jnp.einsum('hqd,hkd->hqk', q, k, preferred_element_type=jnp.float32)
    if scale:                       # mirrors `if scale:` in ScaledDotProductAttention
        s = s * scale
    s = s - jnp.max(s, axis=-1, keepdims=True)
    p = jnp.exp(s)
    p = p * pl.reciprocal(jnp.sum(p, axis=-1, keepdims=True), approx=True)
    ch = jnp.einsum('hqk,hkd->hqd', p, v,
                    preferred_element_type=jnp.float32)      # [H, L, dph]

    # ---- linear_final on the torch-contiguous context view ---------------- #
    # ctx.view(B, L, D)[l = A*h + a, c*dph + j] == ch[h, a*H + c, j], so
    # o = ctx @ Wo is a sum of dph-column chunk matmuls; no lane reshape needed.
    # Row ordering of `o` is the (a, h) "permuted" order; x was permuted to match.
    o = jnp.zeros((seq, d_model), jnp.float32)
    for c in range(num_heads):
        rows_c = jnp.concatenate(
            [ch[:, a * num_heads + c, :] for a in range(rows_per_group)], axis=0)
        o = o + jnp.dot(rows_c, wo3_ref[c], preferred_element_type=jnp.float32)
    o = o + bo_ref[...]

    # ---- residual + LayerNorm --------------------------------------------- #
    y = xp_ref[0] + o
    mu = jnp.mean(y, axis=-1, keepdims=True)
    var = jnp.mean((y - mu) * (y - mu), axis=-1, keepdims=True)
    yn = (y - mu) * jax.lax.rsqrt(var + LN_EPS) * g_ref[...] + beta_ref[...]

    # torch.sum(sent_emd, dim=1)  (permutation invariant over rows) -> [1, D]
    s_emb = jnp.sum(yn, axis=0, keepdims=True)

    # ---- fc1 -> relu -> fc2 -> relu -> fc3 (dropout = identity, eval) ------ #
    h1 = jnp.maximum(
        jnp.dot(s_emb, w1_ref[...], preferred_element_type=jnp.float32) + b1_ref[...], 0.0)
    h2 = jnp.maximum(
        jnp.dot(h1, w2_ref[...], preferred_element_type=jnp.float32) + b2_ref[...], 0.0)
    h3 = jnp.dot(h2, w3_ref[...], preferred_element_type=jnp.float32) + b3_ref[...]
    out_ref[0] = h3        # [1, 128] lane-dense; first n_classes lanes are the logits


# ----------------------------- weight packing (one-off) -------------------- #

def pack_params(params, num_heads=NUM_HEADS):
    """One-off packing of weights into kernel-friendly layouts (not per-call)."""
    D = params["emb"].shape[1]
    dph = D // num_heads
    row = lambda vec: vec.reshape(1, -1)

    wqkv = jnp.concatenate([params["wq"], params["wk"], params["wv"]], axis=1)   # [D, 3D]
    bqkv = jnp.concatenate([params["bq"], params["bk"], params["bv"]]).reshape(1, 3 * D)

    n_cls = params["w3"].shape[1]
    w3p = jnp.zeros((params["w3"].shape[0], OUT_PAD), jnp.float32).at[:, :n_cls].set(params["w3"])
    b3p = jnp.zeros((1, OUT_PAD), jnp.float32).at[:, :n_cls].set(params["b3"])

    return dict(
        emb=params["emb"],
        wqkv=wqkv, bqkv=bqkv,
        wo3=params["wo"].reshape(num_heads, dph, D),     # [H, dph, D]
        bo=row(params["bo"]),
        ln_g=row(params["ln_g"]), ln_b=row(params["ln_b"]),
        w1=params["w1"], b1=row(params["b1"]),
        w2=params["w2"], b2=row(params["b2"]),
        w3p=w3p, b3p=b3p,
    )


# ----------------------------- wrapper ------------------------------------ #

@functools.partial(jax.jit, static_argnames=("num_heads", "n_classes"))
def e2e_forward(sentence, packed, num_heads=NUM_HEADS, n_classes=N_CLASSES):
    B, L = sentence.shape
    D = packed["emb"].shape[1]
    dph = D // num_heads
    assert dph * num_heads == D
    # torch's contiguous view gives per-head seq length L; the chunk
    # decomposition additionally assumes L % num_heads == 0 (true for demo shapes).
    assert L % num_heads == 0
    A = L // num_heads                       # original rows feeding one head

    # ---- glue (XLA, tiny): embedding gather -------------------------------- #
    x = packed["emb"][sentence].astype(jnp.float32)                  # [B, L, D]
    x2d = x.reshape(B * L, D)

    # ---- call 1: fused Q/K/V projection over all B*L rows ------------------ #
    qkv = pl.pallas_call(
        _qkv_kernel,
        out_shape=jax.ShapeDtypeStruct((B * L, 3 * D), jnp.float32),
    )(x2d, packed["wqkv"], packed["bqkv"])

    # torch `.view(batch*heads, -1, dph)` == contiguous reshape (free on HBM).
    qh = qkv[:, :D].reshape(B, num_heads, L, dph)
    kh = qkv[:, D:2 * D].reshape(B, num_heads, L, dph)
    vh = qkv[:, 2 * D:].reshape(B, num_heads, L, dph)

    # Residual rows permuted to the kernel's (a, h) row order: row a*H+h = x[A*h+a].
    x_perm = x.reshape(B, num_heads, A, D).transpose(0, 2, 1, 3).reshape(B, L, D)

    # torch: scale = (key.size(-1) // num_heads) ** (-0.5)
    scale = float(dph // num_heads) ** (-0.5)

    h1dim = packed["w1"].shape[1]
    h2dim = packed["w2"].shape[1]

    bhead = lambda shp: pl.BlockSpec((1,) + shp, lambda b: (b,) + (0,) * len(shp))
    const = lambda shp: pl.BlockSpec(shp, lambda b: (0,) * len(shp))

    # ---- call 2: fused attention + linear_final + LN + sum + MLP ----------- #
    out = pl.pallas_call(
        functools.partial(_attn_block_kernel, scale=scale,
                          num_heads=num_heads, rows_per_group=A),
        out_shape=jax.ShapeDtypeStruct((B, 1, OUT_PAD), jnp.float32),
        grid=(B,),
        in_specs=[bhead((num_heads, L, dph)), bhead((num_heads, L, dph)),
                  bhead((num_heads, L, dph)), bhead((L, D)),
                  const((num_heads, dph, D)), const((1, D)),      # linear_final
                  const((1, D)), const((1, D)),                   # layer_norm
                  const((D, h1dim)), const((1, h1dim)),           # fc1
                  const((h1dim, h2dim)), const((1, h2dim)),       # fc2
                  const((h2dim, OUT_PAD)), const((1, OUT_PAD))],  # fc3 (padded)
        out_specs=pl.BlockSpec((1, 1, OUT_PAD), lambda b: (b, 0, 0)),
        compiler_params=pltpu.CompilerParams(dimension_semantics=("parallel",)),
    )(qh, kh, vh, x_perm,
      packed["wo3"], packed["bo"], packed["ln_g"], packed["ln_b"],
      packed["w1"], packed["b1"], packed["w2"], packed["b2"],
      packed["w3p"], packed["b3p"])

    return out.reshape(B, OUT_PAD)[:, :n_classes]


# ----------------------------- pure-JAX reference --------------------------- #

def reference_forward(sentence, params, num_heads=NUM_HEADS):
    """Direct jnp transcription of the PyTorch module forward (eval mode)."""
    B, L = sentence.shape
    D = params["emb"].shape[1]
    dph = D // num_heads
    x = params["emb"][sentence].astype(jnp.float32)                  # [B, L, D]
    residual = x
    k = x @ params["wk"] + params["bk"]
    v = x @ params["wv"] + params["bv"]
    q = x @ params["wq"] + params["bq"]
    k = k.reshape(B * num_heads, -1, dph)
    v = v.reshape(B * num_heads, -1, dph)
    q = q.reshape(B * num_heads, -1, dph)
    scale = float(dph // num_heads) ** (-0.5)
    attn = jnp.einsum('bij,bkj->bik', q, k) * scale
    attn = jax.nn.softmax(attn, axis=2)
    ctx = jnp.einsum('bik,bkj->bij', attn, v).reshape(B, -1, D)
    out = ctx @ params["wo"] + params["bo"]
    y = residual + out
    mu = jnp.mean(y, axis=-1, keepdims=True)
    var = jnp.mean((y - mu) ** 2, axis=-1, keepdims=True)
    y = (y - mu) / jnp.sqrt(var + LN_EPS) * params["ln_g"] + params["ln_b"]
    s = jnp.sum(y, axis=1)
    h1 = jax.nn.relu(s @ params["w1"] + params["b1"])
    h2 = jax.nn.relu(h1 @ params["w2"] + params["b2"])
    return h2 @ params["w3"] + params["b3"]


# ----------------------------- params -------------------------------------- #

def init_params(key, vocab_size, D):
    keys = jax.random.split(key, 16)

    def linear(kw, kb, fan_in, fan_out):
        bound = 1.0 / (fan_in ** 0.5)
        w = jax.random.uniform(kw, (fan_in, fan_out), jnp.float32, -bound, bound)
        b = jax.random.uniform(kb, (fan_out,), jnp.float32, -bound, bound)
        return w, b

    emb = jax.random.normal(keys[0], (vocab_size, D), jnp.float32) * 0.1
    emb = emb.at[0].set(0.0)                      # padding_idx=0 row is zero
    wq, bq = linear(keys[1], keys[2], D, D)
    wk, bk = linear(keys[3], keys[4], D, D)
    wv, bv = linear(keys[5], keys[6], D, D)
    wo, bo = linear(keys[7], keys[8], D, D)
    w1, b1 = linear(keys[9], keys[10], D, 256)
    w2, b2 = linear(keys[11], keys[12], 256, 128)
    w3, b3 = linear(keys[13], keys[14], 128, N_CLASSES)
    return dict(emb=emb,
                wq=wq, bq=bq, wk=wk, bk=bk, wv=wv, bv=bv, wo=wo, bo=bo,
                ln_g=jnp.ones((D,), jnp.float32), ln_b=jnp.zeros((D,), jnp.float32),
                w1=w1, b1=b1, w2=w2, b2=b2, w3=w3, b3=b3)


# ----------------------------- main ----------------------------------------- #

if __name__ == "__main__":
    # vocab_size=50, embedding_dim=128 (8 heads, dph=16, and dph // num_heads >= 1
    # as the torch scale formula requires), seq len L=16, batch B=2.
    # feature_dim / max_len are unused in the torch forward.
    vocab_size, D, L, B = 50, 128, 16, 2

    key = jax.random.PRNGKey(0)
    pkey, skey = jax.random.split(key)
    params = init_params(pkey, vocab_size, D)
    packed = pack_params(params)
    sentence = jax.random.randint(skey, (B, L), 0, vocab_size, dtype=jnp.int32)

    logits = jax.block_until_ready(e2e_forward(sentence, packed))
    assert logits.shape == (B, N_CLASSES) and logits.dtype == jnp.float32

    # Correctness check against a pure-JAX transcription of the torch forward.
    ref = jax.block_until_ready(reference_forward(sentence, params))
    max_err = float(jnp.max(jnp.abs(logits - ref)))
    tol = 5e-2 * (1.0 + float(jnp.max(jnp.abs(ref))))
    assert max_err < tol, f"kernel/reference mismatch: {max_err} (tol {tol})"

    print("KERNEL_OK")
</pallas_src>

<mosaic_0001>
module attributes {stable_mosaic.version = 11 : i64} {
  func.func @_qkv_kernel(%arg0: memref<32x128xf32, #tpu.memory_space<vmem>>, %arg1: memref<128x384xf32, #tpu.memory_space<vmem>>, %arg2: memref<1x384xf32, #tpu.memory_space<vmem>>, %arg3: memref<32x384xf32, #tpu.memory_space<vmem>>) attributes {dimension_semantics = [], scalar_prefetch = 0 : i64, scratch_operands = 0 : i64, tpu.core_type = #tpu.core_type<tc>} {
    %c0 = arith.constant 0 : index
    %c0_0 = arith.constant 0 : index
    %0 = vector.load %arg0[%c0, %c0_0] : memref<32x128xf32, #tpu.memory_space<vmem>>, vector<32x128xf32>
    %c0_1 = arith.constant 0 : index
    %c0_2 = arith.constant 0 : index
    %1 = vector.load %arg1[%c0_1, %c0_2] : memref<128x384xf32, #tpu.memory_space<vmem>>, vector<128x384xf32>
    %cst = arith.constant dense<0.000000e+00> : vector<32x384xf32>
    %2 = tpu.matmul %0, %1, %cst {dimension_numbers = #tpu.dot_dimension_numbers<[1], [0], [0], [1], [0, 0, 1, 1], [], []>} : vector<32x128xf32>, vector<128x384xf32>, vector<32x384xf32> -> vector<32x384xf32>
    %c0_3 = arith.constant 0 : index
    %c0_4 = arith.constant 0 : index
    %3 = vector.load %arg2[%c0_3, %c0_4] : memref<1x384xf32, #tpu.memory_space<vmem>>, vector<1x384xf32>
    %4 = vector.broadcast %3 : vector<1x384xf32> to vector<32x384xf32>
    %5 = arith.addf %2, %4 : vector<32x384xf32>
    %c0_5 = arith.constant 0 : index
    %c0_6 = arith.constant 0 : index
    %6 = vector.load %arg3[%c0_5, %c0_6] : memref<32x384xf32, #tpu.memory_space<vmem>>, vector<32x384xf32>
    tpu.vector_store %arg3[%c0_5, %c0_6], %5 {strides = array<i32>} : memref<32x384xf32, #tpu.memory_space<vmem>>, vector<32x384xf32>,
    return
  }
}

module attributes {stable_mosaic.version = 11 : i64} {
  func.func @_attn_block_kernel(%arg0: i32, %arg1: memref<1x8x16x16xf32, #tpu.memory_space<vmem>>, %arg2: memref<1x8x16x16xf32, #tpu.memory_space<vmem>>, %arg3: memref<1x8x16x16xf32, #tpu.memory_space<vmem>>, %arg4: memref<1x16x128xf32, #tpu.memory_space<vmem>>, %arg5: memref<8x16x128xf32, #tpu.memory_space<vmem>>, %arg6: memref<1x128xf32, #tpu.memory_space<vmem>>, %arg7: memref<1x128xf32, #tpu.memory_space<vmem>>, %arg8: memref<1x128xf32, #tpu.memory_space<vmem>>, %arg9: memref<128x256xf32, #tpu.memory_space<vmem>>, %arg10: memref<1x256xf32, #tpu.memory_space<vmem>>, %arg11: memref<256x128xf32, #tpu.memory_space<vmem>>, %arg12: memref<1x128xf32, #tpu.memory_space<vmem>>, %arg13: memref<128x128xf32, #tpu.memory_space<vmem>>, %arg14: memref<1x128xf32, #tpu.memory_space<vmem>>, %arg15: memref<1x1x128xf32, #tpu.memory_space<vmem>>) attributes {dimension_semantics = [#tpu.dimension_semantics<parallel>], iteration_bounds = array<i64: 2>, scalar_prefetch = 0 : i64, scratch_operands = 0 : i64, tpu.core_type = #tpu.core_type<tc>, window_params = [{transform_indices = @transform_0, window_bounds = array<i64: 1, 8, 16, 16>}, {transform_indices = @transform_1, window_bounds = array<i64: 1, 8, 16, 16>}, {transform_indices = @transform_2, window_bounds = array<i64: 1, 8, 16, 16>}, {transform_indices = @transform_3, window_bounds = array<i64: 1, 16, 128>}, {pipeline_mode = #tpu.pipeline_mode<synchronous>, transform_indices = @transform_4, window_bounds = array<i64: 8, 16, 128>}, {pipeline_mode = #tpu.pipeline_mode<synchronous>, transform_indices = @transform_5, window_bounds = array<i64: 1, 128>}, {pipeline_mode = #tpu.pipeline_mode<synchronous>, transform_indices = @transform_6, window_bounds = array<i64: 1, 128>}, {pipeline_mode = #tpu.pipeline_mode<synchronous>, transform_indices = @transform_7, window_bounds = array<i64: 1, 128>}, {pipeline_mode = #tpu.pipeline_mode<synchronous>, transform_indices = @transform_8, window_bounds = array<i64: 128, 256>}, {pipeline_mode = #tpu.pipeline_mode<synchronous>, transform_indices = @transform_9, window_bounds = array<i64: 1, 256>}, {pipeline_mode = #tpu.pipeline_mode<synchronous>, transform_indices = @transform_10, window_bounds = array<i64: 256, 128>}, {pipeline_mode = #tpu.pipeline_mode<synchronous>, transform_indices = @transform_11, window_bounds = array<i64: 1, 128>}, {pipeline_mode = #tpu.pipeline_mode<synchronous>, transform_indices = @transform_12, window_bounds = array<i64: 128, 128>}, {pipeline_mode = #tpu.pipeline_mode<synchronous>, transform_indices = @transform_13, window_bounds = array<i64: 1, 128>}, {transform_indices = @transform_14, window_bounds = array<i64: 1, 1, 128>}]} {
    %c0 = arith.constant 0 : index
    %c0_0 = arith.constant 0 : index
    %c0_1 = arith.constant 0 : index
    %c0_2 = arith.constant 0 : index
    %0 = vector.load %arg1[%c0, %c0_0, %c0_1, %c0_2] : memref<1x8x16x16xf32, #tpu.memory_space<vmem>>, vector<1x8x16x16xf32>
    %1 = vector.shape_cast %0 : vector<1x8x16x16xf32> to vector<8x16x16xf32>
    %c0_3 = arith.constant 0 : index
    %c0_4 = arith.constant 0 : index
    %c0_5 = arith.constant 0 : index
    %c0_6 = arith.constant 0 : index
    %2 = vector.load %arg2[%c0_3, %c0_4, %c0_5, %c0_6] : memref<1x8x16x16xf32, #tpu.memory_space<vmem>>, vector<1x8x16x16xf32>
    %3 = vector.shape_cast %2 : vector<1x8x16x16xf32> to vector<8x16x16xf32>
    %c0_7 = arith.constant 0 : index
    %c0_8 = arith.constant 0 : index
    %c0_9 = arith.constant 0 : index
    %c0_10 = arith.constant 0 : index
    %4 = vector.load %arg3[%c0_7, %c0_8, %c0_9, %c0_10] : memref<1x8x16x16xf32, #tpu.memory_space<vmem>>, vector<1x8x16x16xf32>
    %5 = vector.shape_cast %4 : vector<1x8x16x16xf32> to vector<8x16x16xf32>
    "tpu.trace_start"() <{level = 10 : i32, message = "hqd,hkd->hqk"}> : () -> ()
    %cst = arith.constant dense<0.000000e+00> : vector<8x16x16xf32>
    %6 = tpu.matmul %1, %3, %cst {dimension_numbers = #tpu.dot_dimension_numbers<[2], [2], [1], [1], [0, 0, 0, 1, 1, 1], [0], [0]>} : vector<8x16x16xf32>, vector<8x16x16xf32>, vector<8x16x16xf32> -> vector<8x16x16xf32>
    "tpu.trace_stop"() : () -> ()
    %cst_11 = arith.constant 0.707106769 : f32
    %7 = vector.broadcast %cst_11 : f32 to vector<8x16x16xf32>
    %8 = arith.mulf %6, %7 : vector<8x16x16xf32>
    %cst_12 = arith.constant dense<0xFF800000> : vector<8x16xf32>
    %9 = vector.multi_reduction <maximumf>, %8, %cst_12 [2] : vector<8x16x16xf32> to vector<8x16xf32>
    %10 = vector.shape_cast %9 : vector<8x16xf32> to vector<8x16x1xf32>
    %11 = vector.broadcast %10 : vector<8x16x1xf32> to vector<8x16x16xf32>
    %12 = arith.subf %8, %11 : vector<8x16x16xf32>
    %13 = math.exp %12 : vector<8x16x16xf32>
    %cst_13 = arith.constant dense<0.000000e+00> : vector<8x16xf32>
    %14 = vector.multi_reduction <add>, %13, %cst_13 [2] : vector<8x16x16xf32> to vector<8x16xf32>
    %15 = vector.shape_cast %14 : vector<8x16xf32> to vector<8x16x1xf32>
    %16 = tpu.reciprocal %15 {approx = true} : vector<8x16x1xf32> -> vector<8x16x1xf32>
    %17 = vector.broadcast %16 : vector<8x16x1xf32> to vector<8x16x16xf32>
    %18 = arith.mulf %13, %17 : vector<8x16x16xf32>
    "tpu.trace_start"() <{level = 10 : i32, message = "hqk,hkd->hqd"}> : () -> ()
    %cst_14 = arith.constant dense<0.000000e+00> : vector<8x16x16xf32>
    %19 = tpu.matmul %18, %5, %cst_14 {dimension_numbers = #tpu.dot_dimension_numbers<[2], [1], [1], [2], [0, 0, 0, 1, 1, 2], [0], [0]>} : vector<8x16x16xf32>, vector<8x16x16xf32>, vector<8x16x16xf32> -> vector<8x16x16xf32>
    %cst_15 = arith.constant 0.000000e+00 : f32
    "tpu.trace_stop"() : () -> ()
    %20 = vector.broadcast %cst_15 : f32 to vector<16x128xf32>
    %21 = vector.extract_strided_slice %19 {offsets = [0, 0, 0], sizes = [8, 1, 16], strides = [1, 1, 1]} : vector<8x16x16xf32> to vector<8x1x16xf32>
    %22 = vector.shape_cast %21 : vector<8x1x16xf32> to vector<8x16xf32>
    %23 = vector.extract_strided_slice %19 {offsets = [0, 8, 0], sizes = [8, 1, 16], strides = [1, 1, 1]} : vector<8x16x16xf32> to vector<8x1x16xf32>
    %24 = vector.shape_cast %23 : vector<8x1x16xf32> to vector<8x16xf32>
    %25 = tpu.concatenate %22, %24 in 0 : vector<8x16xf32>, vector<8x16xf32> -> vector<16x16xf32>
    %c0_16 = arith.constant 0 : index
    %c0_17 = arith.constant 0 : index
    %c0_18 = arith.constant 0 : index
    %26 = vector.load %arg5[%c0_16, %c0_17, %c0_18] : memref<8x16x128xf32, #tpu.memory_space<vmem>>, vector<1x16x128xf32>
    %27 = vector.shape_cast %26 : vector<1x16x128xf32> to vector<16x128xf32>
    %cst_19 = arith.constant dense<0.000000e+00> : vector<16x128xf32>
    %28 = tpu.matmul %25, %27, %cst_19 {dimension_numbers = #tpu.dot_dimension_numbers<[1], [0], [0], [1], [0, 0, 1, 1], [], []>} : vector<16x16xf32>, vector<16x128xf32>, vector<16x128xf32> -> vector<16x128xf32>
    %29 = arith.addf %20, %28 : vector<16x128xf32>
    %30 = vector.extract_strided_slice %19 {offsets = [0, 1, 0], sizes = [8, 1, 16], strides = [1, 1, 1]} : vector<8x16x16xf32> to vector<8x1x16xf32>
    %31 = vector.shape_cast %30 : vector<8x1x16xf32> to vector<8x16xf32>
    %32 = vector.extract_strided_slice %19 {offsets = [0, 9, 0], sizes = [8, 1, 16], strides = [1, 1, 1]} : vector<8x16x16xf32> to vector<8x1x16xf32>
    %33 = vector.shape_cast %32 : vector<8x1x16xf32> to vector<8x16xf32>
    %34 = tpu.concatenate %31, %33 in 0 : vector<8x16xf32>, vector<8x16xf32> -> vector<16x16xf32>
    %c1 = arith.constant 1 : index
    %c0_20 = arith.constant 0 : index
    %c0_21 = arith.constant 0 : index
    %35 = vector.load %arg5[%c1, %c0_20, %c0_21] : memref<8x16x128xf32, #tpu.memory_space<vmem>>, vector<1x16x128xf32>
    %36 = vector.shape_cast %35 : vector<1x16x128xf32> to vector<16x128xf32>
    %cst_22 = arith.constant dense<0.000000e+00> : vector<16x128xf32>
    %37 = tpu.matmul %34, %36, %cst_22 {dimension_numbers = #tpu.dot_dimension_numbers<[1], [0], [0], [1], [0, 0, 1, 1], [], []>} : vector<16x16xf32>, vector<16x128xf32>, vector<16x128xf32> -> vector<16x128xf32>
    %38 = arith.addf %29, %37 : vector<16x128xf32>
    %39 = vector.extract_strided_slice %19 {offsets = [0, 2, 0], sizes = [8, 1, 16], strides = [1, 1, 1]} : vector<8x16x16xf32> to vector<8x1x16xf32>
    %40 = vector.shape_cast %39 : vector<8x1x16xf32> to vector<8x16xf32>
    %41 = vector.extract_strided_slice %19 {offsets = [0, 10, 0], sizes = [8, 1, 16], strides = [1, 1, 1]} : vector<8x16x16xf32> to vector<8x1x16xf32>
    %42 = vector.shape_cast %41 : vector<8x1x16xf32> to vector<8x16xf32>
    %43 = tpu.concatenate %40, %42 in 0 : vector<8x16xf32>, vector<8x16xf32> -> vector<16x16xf32>
    %c2 = arith.constant 2 : index
    %c0_23 = arith.constant 0 : index
    %c0_24 = arith.constant 0 : index
    %44 = vector.load %arg5[%c2, %c0_23, %c0_24] : memref<8x16x128xf32, #tpu.memory_space<vmem>>, vector<1x16x128xf32>
    %45 = vector.shape_cast %44 : vector<1x16x128xf32> to vector<16x128xf32>
    %cst_25 = arith.constant dense<0.000000e+00> : vector<16x128xf32>
    %46 = tpu.matmul %43, %45, %cst_25 {dimension_numbers = #tpu.dot_dimension_numbers<[1], [0], [0], [1], [0, 0, 1, 1], [], []>} : vector<16x16xf32>, vector<16x128xf32>, vector<16x128xf32> -> vector<16x128xf32>
    %47 = arith.addf %38, %46 : vector<16x128xf32>
    %48 = vector.extract_strided_slice %19 {offsets = [0, 3, 0], sizes = [8, 1, 16], strides = [1, 1, 1]} : vector<8x16x16xf32> to vector<8x1x16xf32>
    %49 = vector.shape_cast %48 : vector<8x1x16xf32> to vector<8x16xf32>
    %50 = vector.extract_strided_slice %19 {offsets = [0, 11, 0], sizes = [8, 1, 16], strides = [1, 1, 1]} : vector<8x16x16xf32> to vector<8x1x16xf32>
    %51 = vector.shape_cast %50 : vector<8x1x16xf32> to vector<8x16xf32>
    %52 = tpu.concatenate %49, %51 in 0 : vector<8x16xf32>, vector<8x16xf32> -> vector<16x16xf32>
    %c3 = arith.constant 3 : index
    %c0_26 = arith.constant 0 : index
    %c0_27 = arith.constant 0 : index
    %53 = vector.load %arg5[%c3, %c0_26, %c0_27] : memref<8x16x128xf32, #tpu.memory_space<vmem>>, vector<1x16x128xf32>
    %54 = vector.shape_cast %53 : vector<1x16x128xf32> to vector<16x128xf32>
    %cst_28 = arith.constant dense<0.000000e+00> : vector<16x128xf32>
    %55 = tpu.matmul %52, %54, %cst_28 {dimension_numbers = #tpu.dot_dimension_numbers<[1], [0], [0], [1], [0, 0, 1, 1], [], []>} : vector<16x16xf32>, vector<16x128xf32>, vector<16x128xf32> -> vector<16x128xf32>
    %56 = arith.addf %47, %55 : vector<16x128xf32>
    %57 = vector.extract_strided_slice %19 {offsets = [0, 4, 0], sizes = [8, 1, 16], strides = [1, 1, 1]} : vector<8x16x16xf32> to vector<8x1x16xf32>
    %58 = vector.shape_cast %57 : vector<8x1x16xf32> to vector<8x16xf32>
    %59 = vector.extract_strided_slice %19 {offsets = [0, 12, 0], sizes = [8, 1, 16], strides = [1, 1, 1]} : vector<8x16x16xf32> to vector<8x1x16xf32>
    %60 = vector.shape_cast %59 : vector<8x1x16xf32> to vector<8x16xf32>
    %61 = tpu.concatenate %58, %60 in 0 : vector<8x16xf32>, vector<8x16xf32> -> vector<16x16xf32>
    %c4 = arith.constant 4 : index
    %c0_29 = arith.constant 0 : index
    %c0_30 = arith.constant 0 : index
    %62 = vector.load %arg5[%c4, %c0_29, %c0_30] : memref<8x16x128xf32, #tpu.memory_space<vmem>>, vector<1x16x128xf32>
    %63 = vector.shape_cast %62 : vector<1x16x128xf32> to vector<16x128xf32>
    %cst_31 = arith.constant dense<0.000000e+00> : vector<16x128xf32>
    %64 = tpu.matmul %61, %63, %cst_31 {dimension_numbers = #tpu.dot_dimension_numbers<[1], [0], [0], [1], [0, 0, 1, 1], [], []>} : vector<16x16xf32>, vector<16x128xf32>, vector<16x128xf32> -> vector<16x128xf32>
    %65 = arith.addf %56, %64 : vector<16x128xf32>
    %66 = vector.extract_strided_slice %19 {offsets = [0, 5, 0], sizes = [8, 1, 16], strides = [1, 1, 1]} : vector<8x16x16xf32> to vector<8x1x16xf32>
    %67 = vector.shape_cast %66 : vector<8x1x16xf32> to vector<8x16xf32>
    %68 = vector.extract_strided_slice %19 {offsets = [0, 13, 0], sizes = [8, 1, 16], strides = [1, 1, 1]} : vector<8x16x16xf32> to vector<8x1x16xf32>
    %69 = vector.shape_cast %68 : vector<8x1x16xf32> to vector<8x16xf32>
    %70 = tpu.concatenate %67, %69 in 0 : vector<8x16xf32>, vector<8x16xf32> -> vector<16x16xf32>
    %c5 = arith.constant 5 : index
    %c0_32 = arith.constant 0 : index
    %c0_33 = arith.constant 0 : index
    %71 = vector.load %arg5[%c5, %c0_32, %c0_33] : memref<8x16x128xf32, #tpu.memory_space<vmem>>, vector<1x16x128xf32>
    %72 = vector.shape_cast %71 : vector<1x16x128xf32> to vector<16x128xf32>
    %cst_34 = arith.constant dense<0.000000e+00> : vector<16x128xf32>
    %73 = tpu.matmul %70, %72, %cst_34 {dimension_numbers = #tpu.dot_dimension_numbers<[1], [0], [0], [1], [0, 0, 1, 1], [], []>} : vector<16x16xf32>, vector<16x128xf32>, vector<16x128xf32> -> vector<16x128xf32>
    %74 = arith.addf %65, %73 : vector<16x128xf32>
    %75 = vector.extract_strided_slice %19 {offsets = [0, 6, 0], sizes = [8, 1, 16], strides = [1, 1, 1]} : vector<8x16x16xf32> to vector<8x1x16xf32>
    %76 = vector.shape_cast %75 : vector<8x1x16xf32> to vector<8x16xf32>
    %77 = vector.extract_strided_slice %19 {offsets = [0, 14, 0], sizes = [8, 1, 16], strides = [1, 1, 1]} : vector<8x16x16xf32> to vector<8x1x16xf32>
    %78 = vector.shape_cast %77 : vector<8x1x16xf32> to vector<8x16xf32>
    %79 = tpu.concatenate %76, %78 in 0 : vector<8x16xf32>, vector<8x16xf32> -> vector<16x16xf32>
    %c6 = arith.constant 6 : index
    %c0_35 = arith.constant 0 : index
    %c0_36 = arith.constant 0 : index
    %80 = vector.load %arg5[%c6, %c0_35, %c0_36] : memref<8x16x128xf32, #tpu.memory_space<vmem>>, vector<1x16x128xf32>
    %81 = vector.shape_cast %80 : vector<1x16x128xf32> to vector<16x128xf32>
    %cst_37 = arith.constant dense<0.000000e+00> : vector<16x128xf32>
    %82 = tpu.matmul %79, %81, %cst_37 {dimension_numbers = #tpu.dot_dimension_numbers<[1], [0], [0], [1], [0, 0, 1, 1], [], []>} : vector<16x16xf32>, vector<16x128xf32>, vector<16x128xf32> -> vector<16x128xf32>
    %83 = arith.addf %74, %82 : vector<16x128xf32>
    %84 = vector.extract_strided_slice %19 {offsets = [0, 7, 0], sizes = [8, 1, 16], strides = [1, 1, 1]} : vector<8x16x16xf32> to vector<8x1x16xf32>
    %85 = vector.shape_cast %84 : vector<8x1x16xf32> to vector<8x16xf32>
    %86 = vector.extract_strided_slice %19 {offsets = [0, 15, 0], sizes = [8, 1, 16], strides = [1, 1, 1]} : vector<8x16x16xf32> to vector<8x1x16xf32>
    %87 = vector.shape_cast %86 : vector<8x1x16xf32> to vector<8x16xf32>
    %88 = tpu.concatenate %85, %87 in 0 : vector<8x16xf32>, vector<8x16xf32> -> vector<16x16xf32>
    %c7 = arith.constant 7 : index
    %c0_38 = arith.constant 0 : index
    %c0_39 = arith.constant 0 : index
    %89 = vector.load %arg5[%c7, %c0_38, %c0_39] : memref<8x16x128xf32, #tpu.memory_space<vmem>>, vector<1x16x128xf32>
    %90 = vector.shape_cast %89 : vector<1x16x128xf32> to vector<16x128xf32>
    %cst_40 = arith.constant dense<0.000000e+00> : vector<16x128xf32>
    %91 = tpu.matmul %88, %90, %cst_40 {dimension_numbers = #tpu.dot_dimension_numbers<[1], [0], [0], [1], [0, 0, 1, 1], [], []>} : vector<16x16xf32>, vector<16x128xf32>, vector<16x128xf32> -> vector<16x128xf32>
    %92 = arith.addf %83, %91 : vector<16x128xf32>
    %c0_41 = arith.constant 0 : index
    %c0_42 = arith.constant 0 : index
    %93 = vector.load %arg6[%c0_41, %c0_42] : memref<1x128xf32, #tpu.memory_space<vmem>>, vector<1x128xf32>
    %94 = vector.broadcast %93 : vector<1x128xf32> to vector<16x128xf32>
    %95 = arith.addf %92, %94 : vector<16x128xf32>
    %c0_43 = arith.constant 0 : index
    %c0_44 = arith.constant 0 : index
    %c0_45 = arith.constant 0 : index
    %96 = vector.load %arg4[%c0_43, %c0_44, %c0_45] : memref<1x16x128xf32, #tpu.memory_space<vmem>>, vector<1x16x128xf32>
    %97 = vector.shape_cast %96 : vector<1x16x128xf32> to vector<16x128xf32>
    %98 = arith.addf %97, %95 : vector<16x128xf32>
    %cst_46 = arith.constant dense<0.000000e+00> : vector<16xf32>
    %99 = vector.multi_reduction <add>, %98, %cst_46 [1] : vector<16x128xf32> to vector<16xf32>
    %100 = vector.shape_cast %99 : vector<16xf32> to vector<16x1xf32>
    %cst_47 = arith.constant 1.280000e+02 : f32
    %101 = vector.broadcast %cst_47 : f32 to vector<16x1xf32>
    %102 = arith.divf %100, %101 : vector<16x1xf32>
    %103 = vector.broadcast %102 : vector<16x1xf32> to vector<16x128xf32>
    %104 = arith.subf %98, %103 : vector<16x128xf32>
    %105 = vector.broadcast %102 : vector<16x1xf32> to vector<16x128xf32>
    %106 = arith.subf %98, %105 : vector<16x128xf32>
    %107 = arith.mulf %104, %106 : vector<16x128xf32>
    %cst_48 = arith.constant dense<0.000000e+00> : vector<16xf32>
    %108 = vector.multi_reduction <add>, %107, %cst_48 [1] : vector<16x128xf32> to vector<16xf32>
    %109 = vector.shape_cast %108 : vector<16xf32> to vector<16x1xf32>
    %cst_49 = arith.constant 1.280000e+02 : f32
    %110 = vector.broadcast %cst_49 : f32 to vector<16x1xf32>
    %111 = arith.divf %109, %110 : vector<16x1xf32>
    %112 = vector.broadcast %102 : vector<16x1xf32> to vector<16x128xf32>
    %113 = arith.subf %98, %112 : vector<16x128xf32>
    %cst_50 = arith.constant 9.99999974E-6 : f32
    %114 = vector.broadcast %cst_50 : f32 to vector<16x1xf32>
    %115 = arith.addf %111, %114 : vector<16x1xf32>
    %116 = math.rsqrt %115 : vector<16x1xf32>
    %117 = vector.broadcast %116 : vector<16x1xf32> to vector<16x128xf32>
    %118 = arith.mulf %113, %117 : vector<16x128xf32>
    %c0_51 = arith.constant 0 : index
    %c0_52 = arith.constant 0 : index
    %119 = vector.load %arg7[%c0_51, %c0_52] : memref<1x128xf32, #tpu.memory_space<vmem>>, vector<1x128xf32>
    %120 = vector.broadcast %119 : vector<1x128xf32> to vector<16x128xf32>
    %121 = arith.mulf %118, %120 : vector<16x128xf32>
    %c0_53 = arith.constant 0 : index
    %c0_54 = arith.constant 0 : index
    %122 = vector.load %arg8[%c0_53, %c0_54] : memref<1x128xf32, #tpu.memory_space<vmem>>, vector<1x128xf32>
    %123 = vector.broadcast %122 : vector<1x128xf32> to vector<16x128xf32>
    %124 = arith.addf %121, %123 : vector<16x128xf32>
    %cst_55 = arith.constant dense<0.000000e+00> : vector<128xf32>
    %125 = vector.multi_reduction <add>, %124, %cst_55 [0] : vector<16x128xf32> to vector<128xf32>
    %126 = vector.shape_cast %125 : vector<128xf32> to vector<1x128xf32>
    %c0_56 = arith.constant 0 : index
    %c0_57 = arith.constant 0 : index
    %127 = vector.load %arg9[%c0_56, %c0_57] : memref<128x256xf32, #tpu.memory_space<vmem>>, vector<128x256xf32>
    %cst_58 = arith.constant dense<0.000000e+00> : vector<1x256xf32>
    %128 = tpu.matmul %126, %127, %cst_58 {dimension_numbers = #tpu.dot_dimension_numbers<[1], [0], [0], [1], [0, 0, 1, 1], [], []>} : vector<1x128xf32>, vector<128x256xf32>, vector<1x256xf32> -> vector<1x256xf32>
    %c0_59 = arith.constant 0 : index
    %c0_60 = arith.constant 0 : index
    %129 = vector.load %arg10[%c0_59, %c0_60] : memref<1x256xf32, #tpu.memory_space<vmem>>, vector<1x256xf32>
    %130 = arith.addf %128, %129 : vector<1x256xf32>
    %cst_61 = arith.constant 0.000000e+00 : f32
    %131 = vector.broadcast %cst_61 : f32 to vector<1x256xf32>
    %132 = arith.maximumf %130, %131 : vector<1x256xf32>
    %c0_62 = arith.constant 0 : index
    %c0_63 = arith.constant 0 : index
    %133 = vector.load %arg11[%c0_62, %c0_63] : memref<256x128xf32, #tpu.memory_space<vmem>>, vector<256x128xf32>
    %cst_64 = arith.constant dense<0.000000e+00> : vector<1x128xf32>
    %134 = tpu.matmul %132, %133, %cst_64 {dimension_numbers = #tpu.dot_dimension_numbers<[1], [0], [0], [1], [0, 0, 1, 1], [], []>} : vector<1x256xf32>, vector<256x128xf32>, vector<1x128xf32> -> vector<1x128xf32>
    %c0_65 = arith.constant 0 : index
    %c0_66 = arith.constant 0 : index
    %135 = vector.load %arg12[%c0_65, %c0_66] : memref<1x128xf32, #tpu.memory_space<vmem>>, vector<1x128xf32>
    %136 = arith.addf %134, %135 : vector<1x128xf32>
    %cst_67 = arith.constant 0.000000e+00 : f32
    %137 = vector.broadcast %cst_67 : f32 to vector<1x128xf32>
    %138 = arith.maximumf %136, %137 : vector<1x128xf32>
    %c0_68 = arith.constant 0 : index
    %c0_69 = arith.constant 0 : index
    %139 = vector.load %arg13[%c0_68, %c0_69] : memref<128x128xf32, #tpu.memory_space<vmem>>, vector<128x128xf32>
    %cst_70 = arith.constant dense<0.000000e+00> : vector<1x128xf32>
    %140 = tpu.matmul %138, %139, %cst_70 {dimension_numbers = #tpu.dot_dimension_numbers<[1], [0], [0], [1], [0, 0, 1, 1], [], []>} : vector<1x128xf32>, vector<128x128xf32>, vector<1x128xf32> -> vector<1x128xf32>
    %c0_71 = arith.constant 0 : index
    %c0_72 = arith.constant 0 : index
    %141 = vector.load %arg14[%c0_71, %c0_72] : memref<1x128xf32, #tpu.memory_space<vmem>>, vector<1x128xf32>
    %142 = arith.addf %140, %141 : vector<1x128xf32>
    %c0_73 = arith.constant 0 : index
    %c0_74 = arith.constant 0 : index
    %c0_75 = arith.constant 0 : index
    %143 = vector.load %arg15[%c0_73, %c0_74, %c0_75] : memref<1x1x128xf32, #tpu.memory_space<vmem>>, vector<1x1x128xf32>
    %144 = vector.shape_cast %143 : vector<1x1x128xf32> to vector<1x128xf32>
    %145 = vector.shape_cast %142 : vector<1x128xf32> to vector<1x1x128xf32>
    tpu.vector_store %arg15[%c0_73, %c0_74, %c0_75], %145 {strides = array<i32>} : memref<1x1x128xf32, #tpu.memory_space<vmem>>, vector<1x1x128xf32>,
    return
  }
  func.func @transform_0(%arg0: i32) -> (i32, i32, i32, i32) {
    %c0_i32 = arith.constant 0 : i32
    %c0_i32_0 = arith.constant 0 : i32
    %c0_i32_1 = arith.constant 0 : i32
    %c0_i32_2 = arith.constant 0 : i32
    return %arg0, %c0_i32, %c0_i32_0, %c0_i32_1 : i32, i32, i32, i32
  }
  func.func @transform_1(%arg0: i32) -> (i32, i32, i32, i32) {
    %c0_i32 = arith.constant 0 : i32
    %c0_i32_0 = arith.constant 0 : i32
    %c0_i32_1 = arith.constant 0 : i32
    %c0_i32_2 = arith.constant 0 : i32
    return %arg0, %c0_i32, %c0_i32_0, %c0_i32_1 : i32, i32, i32, i32
  }
  func.func @transform_2(%arg0: i32) -> (i32, i32, i32, i32) {
    %c0_i32 = arith.constant 0 : i32
    %c0_i32_0 = arith.constant 0 : i32
    %c0_i32_1 = arith.constant 0 : i32
    %c0_i32_2 = arith.constant 0 : i32
    return %arg0, %c0_i32, %c0_i32_0, %c0_i32_1 : i32, i32, i32, i32
  }
  func.func @transform_3(%arg0: i32) -> (i32, i32, i32) {
    %c0_i32 = arith.constant 0 : i32
    %c0_i32_0 = arith.constant 0 : i32
    %c0_i32_1 = arith.constant 0 : i32
    return %arg0, %c0_i32, %c0_i32_0 : i32, i32, i32
  }
  func.func @transform_4(%arg0: i32) -> (i32, i32, i32) {
    %c0_i32 = arith.constant 0 : i32
    %c0_i32_0 = arith.constant 0 : i32
    %c0_i32_1 = arith.constant 0 : i32
    %c0_i32_2 = arith.constant 0 : i32
    return %c0_i32, %c0_i32_0, %c0_i32_1 : i32, i32, i32
  }
  func.func @transform_5(%arg0: i32) -> (i32, i32) {
    %c0_i32 = arith.constant 0 : i32
    %c0_i32_0 = arith.constant 0 : i32
    %c0_i32_1 = arith.constant 0 : i32
    return %c0_i32, %c0_i32_0 : i32, i32
  }
  func.func @transform_6(%arg0: i32) -> (i32, i32) {
    %c0_i32 = arith.constant 0 : i32
    %c0_i32_0 = arith.constant 0 : i32
    %c0_i32_1 = arith.constant 0 : i32
    return %c0_i32, %c0_i32_0 : i32, i32
  }
  func.func @transform_7(%arg0: i32) -> (i32, i32) {
    %c0_i32 = arith.constant 0 : i32
    %c0_i32_0 = arith.constant 0 : i32
    %c0_i32_1 = arith.constant 0 : i32
    return %c0_i32, %c0_i32_0 : i32, i32
  }
  func.func @transform_8(%arg0: i32) -> (i32, i32) {
    %c0_i32 = arith.constant 0 : i32
    %c0_i32_0 = arith.constant 0 : i32
    %c0_i32_1 = arith.constant 0 : i32
    return %c0_i32, %c0_i32_0 : i32, i32
  }
  func.func @transform_9(%arg0: i32) -> (i32, i32) {
    %c0_i32 = arith.constant 0 : i32
    %c0_i32_0 = arith.constant 0 : i32
    %c0_i32_1 = arith.constant 0 : i32
    return %c0_i32, %c0_i32_0 : i32, i32
  }
  func.func @transform_10(%arg0: i32) -> (i32, i32) {
    %c0_i32 = arith.constant 0 : i32
    %c0_i32_0 = arith.constant 0 : i32
    %c0_i32_1 = arith.constant 0 : i32
    return %c0_i32, %c0_i32_0 : i32, i32
  }
  func.func @transform_11(%arg0: i32) -> (i32, i32) {
    %c0_i32 = arith.constant 0 : i32
    %c0_i32_0 = arith.constant 0 : i32
    %c0_i32_1 = arith.constant 0 : i32
    return %c0_i32, %c0_i32_0 : i32, i32
  }
  func.func @transform_12(%arg0: i32) -> (i32, i32) {
    %c0_i32 = arith.constant 0 : i32
    %c0_i32_0 = arith.constant 0 : i32
    %c0_i32_1 = arith.constant 0 : i32
    return %c0_i32, %c0_i32_0 : i32, i32
  }
  func.func @transform_13(%arg0: i32) -> (i32, i32) {
    %c0_i32 = arith.constant 0 : i32
    %c0_i32_0 = arith.constant 0 : i32
    %c0_i32_1 = arith.constant 0 : i32
    return %c0_i32, %c0_i32_0 : i32, i32
  }
  func.func @transform_14(%arg0: i32) -> (i32, i32, i32) {
    %c0_i32 = arith.constant 0 : i32
    %c0_i32_0 = arith.constant 0 : i32
    %c0_i32_1 = arith.constant 0 : i32
    return %arg0, %c0_i32, %c0_i32_0 : i32, i32, i32
  }
}

</mosaic_0001>

<bundles_post_ra>
// kernel: e2e_forward.2
= control target key start
LH: loop header
LB: loop body
LE: loop exit
PB: predicated region body
PF: predicated region fallthrough
CT: control target
= control target key end

     0   :  { %v396_v3 = vmov 0.0   ;;  %s616_s1 = inlined_call_operand.vmem [shape: f32[128,384], index: 1, kind: input, shape index: {}]   ;;  %s617_s0 = inlined_call_operand.vmem [shape: f32[32,128], index: 0, kind: input, shape index: {}]   ;;  %s618_s2 = inlined_call_operand.vmem [shape: f32[1,384], index: 2, kind: input, shape index: {}]   ;;  %s619_s3 = inlined_call_operand.vmem [shape: f32[32,384], index: 3, kind: output, shape index: {}]  }
   0x1   :  { %v19_v0 = vld [vmem:[%s616_s1 + $0x8] sm:$0xff]  ;;  %v22_v1 = vld [vmem:[%s616_s1 + $0x20] sm:$0xff]  ;;  %147 = vmatprep.mubr.f32.mxu0 %v396_v3  ;;  %v21_v5 = vld [vmem:[%s616_s1 + $0x18] sm:$0xff] }
   0x2   :  { %v18_v2 = vld [vmem:[%s616_s1] sm:$0xff]  ;;  %v331_v4 = vpack.c.bf16 %v22_v1, %v19_v0  ;;  %v25_v6 = vld [vmem:[%s616_s1 + $0x38] sm:$0xff]  ;;  %v28_v7 = vld [vmem:[%s616_s1 + $0x50] sm:$0xff] }
   0x3   :  { %v333_v8 = vpack.c.bf16 %v21_v5, %v18_v2  ;;  %v335_v9 = vpack.c.bf16 %v28_v7, %v25_v6  ;;  %v24_v10 = vld [vmem:[%s616_s1 + $0x30] sm:$0xff]  ;;  %v27_v11 = vld [vmem:[%s616_s1 + $0x48] sm:$0xff]  ;;  %v34_v15 = vld [vmem:[%s616_s1 + $0x80] sm:$0xff] }
   0x4   :  { %v20_v12 = vld [vmem:[%s616_s1 + $0x10] sm:$0xff]  ;;  %332 = vmatprep.subr.bf16.mxu0 %v331_v4  ;;  %v23_v13 = vld [vmem:[%s616_s1 + $0x28] sm:$0xff]  ;;  %v337_v16 = vpack.c.bf16 %v27_v11, %v24_v10  ;;  %v26_v18 = vld [vmem:[%s616_s1 + $0x40] sm:$0xff] }
   0x5   :  { %v31_v14 = vld [vmem:[%s616_s1 + $0x68] sm:$0xff]  ;;  %334 = vmatpush1.bf16.msra.mxu0 %v333_v8  ;;  %v363_v17 = vpack.c.bf16 %v23_v13, %v20_v12  ;;  %v30_v20 = vld [vmem:[%s616_s1 + $0x60] sm:$0xff]  ;;  %v33_v21 = vld [vmem:[%s616_s1 + $0x78] sm:$0xff] }
   0x6   :  { %336 = vmatprep.subr.bf16.mxu0 %v335_v9  ;;  %v339_v19 = vpack.c.bf16 %v34_v15, %v31_v14  ;;  %v29_v22 = vld [vmem:[%s616_s1 + $0x58] sm:$0xff]  ;;  %v40_v25 = vld [vmem:[%s616_s1 + $0xb0] sm:$0xff]  ;;  %v35_v27 = vld [vmem:[%s616_s1 + $0x88] sm:$0xff]  ;;  %v341_v28 = vpack.c.bf16 %v33_v21, %v30_v20  ;;  %v68_v14 = vlaneseq }
   0x7   :  { %364 = vmatprep.subr.bf16.mxu1 %v363_v17  ;;  %v367_v23 = vpack.c.bf16 %v29_v22, %v26_v18  ;;  %v37_v24 = vld [vmem:[%s616_s1 + $0x98] sm:$0xff]  ;;  %v32_v26 = vld [vmem:[%s616_s1 + $0x70] sm:$0xff]  ;;  %v39_v32 = vld [vmem:[%s616_s1 + $0xa8] sm:$0xff] }
   0x8   :  { %366 = vmatpush3.bf16.msra.mxu1 %v363_v17  ;;  %v36_v29 = vld [vmem:[%s616_s1 + $0x90] sm:$0xff]  ;;  %v371_v30 = vpack.c.bf16 %v35_v27, %v32_v26  ;;  %v343_v31 = vpack.c.bf16 %v40_v25, %v37_v24  ;;  %v38_v33 = vld [vmem:[%s616_s1 + $0xa0] sm:$0xff]  ;;  %v41_v34 = vld [vmem:[%s616_s1 + $0xb8] sm:$0xff]  ;;  %v69_v15 = vshrl.u32 %v68_v14, 7 }
   0x9   :  { %338 = vmatpush1.bf16.msra.mxu0 %v337_v16  ;;  %368 = vmatprep.subr.bf16.mxu1 %v367_v23  ;;  %v43_v35 = vld [vmem:[%s616_s1 + $0xc8] sm:$0xff]  ;;  %v46_v36 = vld [vmem:[%s616_s1 + $0xe0] sm:$0xff]  ;;  %v345_v37 = vpack.c.bf16 %v39_v32, %v36_v29  ;;  %v375_v39 = vpack.c.bf16 %v41_v34, %v38_v33  ;;  %v45_v41 = vld [vmem:[%s616_s1 + $0xd8] sm:$0xff] }
   0xa   :  { %340 = vmatprep.subr.bf16.mxu0 %v339_v19  ;;  %v42_v38 = vld [vmem:[%s616_s1 + $0xc0] sm:$0xff]  ;;  %v347_v40 = vpack.c.bf16 %v46_v36, %v43_v35  ;;  %v44_v42 = vld [vmem:[%s616_s1 + $0xd0] sm:$0xff]  ;;  %v47_v43 = vld [vmem:[%s616_s1 + $0xe8] sm:$0xff]  ;;  %v70_v16 = vsub.s32 0, %v69_v15  ;;  %v74_v18 = vsub.s32 1, %v69_v15  ;;  %v78_v19 = vsub.s32 2, %v69_v15 }
   0xb   :  { %v49_v44 = vld [vmem:[%s616_s1 + $0xf8] sm:$0xff]  ;;  %v52_v45 = vld [vmem:[%s616_s1 + $0x110] sm:$0xff]  ;;  %v349_v46 = vpack.c.bf16 %v45_v41, %v42_v38  ;;  %v379_v48 = vpack.c.bf16 %v47_v43, %v44_v42  ;;  %v14_v49 = vld [vmem:[%s617_s0] sm:$0xff] }
   0xc   :  { %370 = vmatpush3.bf16.msra.mxu1 %v367_v23  ;;  %v48_v47 = vld [vmem:[%s616_s1 + $0xf0] sm:$0xff]  ;;  %v351_v50 = vpack.c.bf16 %v52_v45, %v49_v44  ;;  %v51_v51 = vld [vmem:[%s616_s1 + $0x108] sm:$0xff]  ;;  %v50_v52 = vld [vmem:[%s616_s1 + $0x100] sm:$0xff]  ;;  %325 = vmatprep.mubr.f32.mxu1 %v14_v49 }
   0xd   :  { %342 = vmatpush1.bf16.msra.mxu0 %v341_v28  ;;  %372 = vmatprep.subr.bf16.mxu1 %v371_v30  ;;  %v53_v53 = vld [vmem:[%s616_s1 + $0x118] sm:$0xff]  ;;  %v55_v54 = vld [vmem:[%s616_s1 + $0x128] sm:$0xff]  ;;  %v58_v55 = vld [vmem:[%s616_s1 + $0x140] sm:$0xff]  ;;  %v353_v56 = vpack.c.bf16 %v51_v51, %v48_v47 }
   0xe   :  { %344 = vmatprep.subr.bf16.mxu0 %v343_v31  ;;  %v54_v57 = vld [vmem:[%s616_s1 + $0x120] sm:$0xff]  ;;  %v383_v58 = vpack.c.bf16 %v53_v53, %v50_v52  ;;  %v355_v59 = vpack.c.bf16 %v58_v55, %v55_v54  ;;  %v57_v60 = vld [vmem:[%s616_s1 + $0x138] sm:$0xff]  ;;  %v56_v61 = vld [vmem:[%s616_s1 + $0x130] sm:$0xff] }
   0xf   :  { %v59_v62 = vld [vmem:[%s616_s1 + $0x148] sm:$0xff]  ;;  %v61_v63 = vld [vmem:[%s616_s1 + $0x158] sm:$0xff]  ;;  %v64_v0 = vld [vmem:[%s616_s1 + $0x170] sm:$0xff]  ;;  %v357_v1 = vpack.c.bf16 %v57_v60, %v54_v57 }
  0x10   :  { %374 = vmatpush3.bf16.msra.mxu1 %v371_v30  ;;  %v60_v2 = vld [vmem:[%s616_s1 + $0x150] sm:$0xff]  ;;  %v387_v4 = vpack.c.bf16 %v59_v62, %v56_v61  ;;  %v359_v5 = vpack.c.bf16 %v64_v0, %v61_v63  ;;  %v63_v6 = vld [vmem:[%s616_s1 + $0x168] sm:$0xff]  ;;  %v62_v7 = vld [vmem:[%s616_s1 + $0x160] sm:$0xff] }
  0x11   :  { %346 = vmatpush1.bf16.msra.mxu0 %v345_v37  ;;  %376 = vmatprep.subr.bf16.mxu1 %v375_v39  ;;  %v65_v8 = vld [vmem:[%s616_s1 + $0x178] sm:$0xff]  ;;  %v361_v9 = vpack.c.bf16 %v63_v6, %v60_v2  ;;  %v15_v11 = vld [vmem:[%s617_s0 + $0x8] sm:$0xff]  ;;  %v16_v12 = vld [vmem:[%s617_s0 + $0x10] sm:$0xff] }
  0x12   :  { %348 = vmatprep.subr.bf16.mxu0 %v347_v40  ;;  %v391_v10 = vpack.c.bf16 %v65_v8, %v62_v7  ;;  %v17_v13 = vld [vmem:[%s617_s0 + $0x18] sm:$0xff]  ;;  %v66_v17 = vld [vmem:[%s618_s2] sm:$0x7] }
  0x13   :  { %v71_v20 = vrot.slane %v66_v17, %v70_v16  ;;  %v75_v21 = vrot.slane %v66_v17, %v74_v18  ;;  %v79_v23 = vrot.slane %v66_v17, %v78_v19 }
  0x14   :  { %378 = vmatpush3.bf16.msra.mxu1 %v375_v39 }
  0x15   :  { %350 = vmatpush1.bf16.msra.mxu0 %v349_v46  ;;  %380 = vmatprep.subr.bf16.mxu1 %v379_v48 }
  0x16   :  { %352 = vmatprep.subr.bf16.mxu0 %v351_v50 }
  0x18   :  { %382 = vmatpush3.bf16.msra.mxu1 %v379_v48 }
  0x19   :  { %354 = vmatpush1.bf16.msra.mxu0 %v353_v56  ;;  %384 = vmatprep.subr.bf16.mxu1 %v383_v58 }
  0x1a   :  { %356 = vmatprep.subr.bf16.mxu0 %v355_v59 }
  0x1c   :  { %386 = vmatpush3.bf16.msra.mxu1 %v383_v58 }
  0x1d   :  { %358 = vmatpush1.bf16.msra.mxu0 %v357_v1  ;;  %388 = vmatprep.subr.bf16.mxu1 %v387_v4 }
  0x1e   :  { %360 = vmatprep.subr.bf16.mxu0 %v359_v5 }
  0x20   :  { %390 = vmatpush3.bf16.msra.mxu1 %v387_v4 }
  0x21   :  { %362 = vmatpush1.bf16.msra.mxu0 %v361_v9  ;;  %392 = vmatprep.subr.bf16.mxu1 %v391_v10 }
  0x24   :  { %148 = vmatmul.mubr.f32.vlgmr.msra.gmra.mrb[0].mxu0 %v14_v49  ;;  %394 = vmatpush3.bf16.msra.mxu1 %v391_v10 }
  0x25   :  { %153 = vmatprep.mubr.f32.mxu0 %v396_v3 }
  0x27   :  { %326 = vmatmul.mubr.f32.vlgmr.msra.gmra.mrb[0].mxu1 %v15_v11 }
  0x28   :  { %154 = vmatmul.mubr.f32.gmra.mrb[2].mxu0 %v15_v11  ;;  %328 = vmatprep.mubr.f32.mxu1 %v16_v12 }
  0x29   :  { %159 = vmatprep.mubr.f32.mxu0 %v396_v3 }
  0x2b   :  { %329 = vmatmul.mubr.f32.gmra.mrb[2].mxu1 %v17_v13 }
  0x2c   :  { %160 = vmatmul.mubr.f32.gmra.mrb[4].mxu0 %v16_v12 }
  0x2d   :  { %165 = vmatprep.mubr.f32.mxu0 %v396_v3 }
  0x30   :  { %166 = vmatmul.mubr.f32.gmra.mrb[6].mxu0 %v17_v13 }
  0xf7   :  { %v149_v22 = vpop.f32.mrb[0].mxu0 }
  0xf8   :  { %v150_v24 = vadd.f32 %v149_v22, %v71_v20  ;;  %v151_v25 = vpop.f32.mrb[1].mxu0 }
  0xf9   :  { %v152_v26 = vadd.f32 %v151_v25, %v75_v21 }
  0xfa   :  { %257 = vst [vmem:[%s619_s3] sm:$0xff] %v150_v24  ;;  %v327_v3 = vpop.f32.mrb[0].mxu1 }
  0xfb   :  { %258 = vst [vmem:[%s619_s3 + $0x8] sm:$0xff] %v152_v26  ;;  %v155_v27 = vpop.f32.mrb[2].mxu0  ;;  %v244_v28 = vadd.f32 %v327_v3, %v79_v23  ;;  %v238_v29 = vpop.f32.mrb[1].mxu1 }
  0xfc   :  { %v156_v30 = vadd.f32 %v155_v27, %v71_v20  ;;  %v157_v31 = vpop.f32.mrb[3].mxu0  ;;  %v239_v32 = vadd.f32 %v238_v29, %v79_v23 }
  0xfd   :  { %v158_v33 = vadd.f32 %v157_v31, %v75_v21  ;;  %262 = vst [vmem:[%s619_s3 + $0x28] sm:$0xff] %v244_v28 }
  0xfe   :  { %260 = vst [vmem:[%s619_s3 + $0x18] sm:$0xff] %v156_v30  ;;  %259 = vst [vmem:[%s619_s3 + $0x10] sm:$0xff] %v239_v32  ;;  %v330_v34 = vpop.f32.mrb[2].mxu1 }
  0xff   :  { %261 = vst [vmem:[%s619_s3 + $0x20] sm:$0xff] %v158_v33  ;;  %v161_v35 = vpop.f32.mrb[4].mxu0  ;;  %v254_v36 = vadd.f32 %v330_v34, %v79_v23  ;;  %v248_v37 = vpop.f32.mrb[3].mxu1 }
 0x100   :  { %v162_v38 = vadd.f32 %v161_v35, %v71_v20  ;;  %v163_v39 = vpop.f32.mrb[5].mxu0  ;;  %v249_v40 = vadd.f32 %v248_v37, %v79_v23 }
 0x101   :  { %v164_v41 = vadd.f32 %v163_v39, %v75_v21  ;;  %268 = vst [vmem:[%s619_s3 + $0x58] sm:$0xff] %v254_v36 }
 0x102   :  { %263 = vst [vmem:[%s619_s3 + $0x30] sm:$0xff] %v162_v38  ;;  %265 = vst [vmem:[%s619_s3 + $0x40] sm:$0xff] %v249_v40 }
 0x103   :  { %264 = vst [vmem:[%s619_s3 + $0x38] sm:$0xff] %v164_v41  ;;  %v167_v42 = vpop.f32.mrb[6].mxu0 }
 0x104   :  { %v168_v43 = vadd.f32 %v167_v42, %v71_v20  ;;  %v169_v44 = vpop.f32.mrb[7].mxu0 }
 0x105   :  { %v170_v45 = vadd.f32 %v169_v44, %v75_v21 }
 0x106   :  { %266 = vst [vmem:[%s619_s3 + $0x48] sm:$0xff] %v168_v43 }
 0x107   :  { %267 = vst [vmem:[%s619_s3 + $0x50] sm:$0xff] %v170_v45 }

// kernel: e2e_forward.3
= control target key start
LH: loop header
LB: loop body
LE: loop exit
PB: predicated region body
PF: predicated region fallthrough
CT: control target
= control target key end

     0   :  { %s5504_s0 = inlined_call_operand.vmem [shape: f32[2,8,16,16], index: 0, kind: input, shape index: {}]   ;;  %s5505_s1 = inlined_call_operand.vmem [shape: f32[2,8,16,16], index: 1, kind: input, shape index: {}]   ;;  %s5506_s2 = inlined_call_operand.vmem [shape: f32[2,8,16,16], index: 2, kind: input, shape index: {}]   ;;  %s5507_s3 = inlined_call_operand.vmem [shape: f32[2,16,128], index: 3, kind: input, shape index: {}]   ;;  %s5508_s4 = inlined_call_operand.vmem [shape: f32[8,16,128], index: 4, kind: input, shape index: {}]   ;;  %s5509_s5 = inlined_call_operand.vmem [shape: f32[1,128], index: 5, kind: input, shape index: {}]   ;;  %s5510_s6 = inlined_call_operand.vmem [shape: f32[1,128], index: 6, kind: input, shape index: {}]   ;;  %s5511_s7 = inlined_call_operand.vmem [shape: f32[1,128], index: 7, kind: input, shape index: {}]   ;;  %s5512_s8 = inlined_call_operand.vmem [shape: f32[128,256], index: 8, kind: input, shape index: {}]   ;;  %s5513_s9 = inlined_call_operand.vmem [shape: f32[1,256], index: 9, kind: input, shape index: {}]   ;;  %s5514_s10 = inlined_call_operand.vmem [shape: f32[256,128], index: 10, kind: input, shape index: {}]   ;;  %s5515_s11 = inlined_call_operand.vmem [shape: f32[1,128], index: 11, kind: input, shape index: {}]   ;;  %s5516_s12 = inlined_call_operand.vmem [shape: f32[128,128], index: 12, kind: input, shape index: {}]   ;;  %s5517_s13 = inlined_call_operand.vmem [shape: f32[1,128], index: 13, kind: input, shape index: {}]   ;;  %s5518_s14 = inlined_call_operand.hbm [shape: f32[2,1,128], index: 14, kind: output, shape index: {}]  }
   0x1   :  { %5522 = sst [smem:[#allocation8_spill]] %s5504_s0 }
   0x2   :  { %5523 = sst [smem:[#allocation9_spill]] %s5505_s1 }
   0x3   :  { %5524 = sst [smem:[#allocation10_spill]] %s5506_s2 }
   0x4   :  { %19 = vsyncpa [#allocation3], 0 }
   0x5   :  { %21 = vsyncpa [#allocation3 + $0x1], 0  ;;  %s4416_s29 = smov 0   ;;  %s4418_s30 = smov 0  }
   0x6   :  { %s4420_s15 = smov 0   ;;  %s4422_s16 = smov 0  }
   0x7 LB: > { %5525 = sst [smem:[#allocation5_spill]] %s4331_s15  ;;  %s4437_s17 = sadd.s32 4294967295, %s4335_s16   ;;  %s4335_s16 = sphi %s4422_s16, %s5535_s16   ;;  %s4331_s15 = sphi %s4420_s15, %s5537_s15   ;;  %s4327_s30 = sphi %s4418_s30, %s5539_s30   ;;  %s4323_s29 = sphi %s4416_s29, %s5538_s29  }
   0x8   : > { %s3498_s18 = sadd.s32 4294967294, %s4335_s16   ;;  %s4441_s19 = sadd.s32 1, %s4335_s16  }
   0x9   : > { %5526 = sst [smem:[#allocation6_spill]] %s4441_s19  ;;  %s348_s20 = sadd.s32 1, %s4331_s15 }
   0xa   : > { %s345_s21 = ssub.s32 %s4335_s16, %s4441_s19  ;;  %p358_p0 = scmp.ne.s32.totalorder %s4331_s15, %s4327_s30 }
   0xb   : > { %p346_p1 = scmp.eq.s32.totalorder %s345_s21, 0  ;;  %p359_p2 = scmp.eq.s32.totalorder %s4437_s17, 1 }
   0xc   : > { %p364_p3 = scmp.ne.s32.totalorder %s4327_s30, %s4323_s29  ;;  %p365_p4 = scmp.eq.s32.totalorder %s3498_s18, 1 }
   0xd   : > { %s4452_s22 = scalar_select %p346_p1, %s4331_s15, %s348_s20  }
   0xe   : > { %p4454_p5 = por %p359_p2, %p358_p0  ;;  %p4458_p6 = por %p365_p4, %p364_p3 }
   0xf   : > { %5527 = sst [smem:[#allocation7_spill]] %s4452_s22  ;;  %p3501_p7 = scmp.ge.s32.totalorder %s4335_s16, 1 }
  0x10   : > { %p445_p8 = scmp.lt.s32.totalorder %s4335_s16, 3 }
  0x12   : > { %p446_p9 = pnand %p3501_p7, %p445_p8 }
  0x13   : > { %p505_p10 = scmp.lt.s32.totalorder (!%p446_p9), %s4437_s17, 1  ;;  %vm573_vm0 = vcmask (!%p446_p9), 130048   ;;  %s5530_s1 = sld [smem:[#allocation9_spill]] (!%p446_p9)  ;;  %vm2119_vm2 = vcmask (!%p446_p9), 1041409   ;;  %vm2122_vm3 = vcmask (!%p446_p9), 1042434   ;;  %vm2125_vm4 = vcmask (!%p446_p9), 1043459  }
  0x14   : > { %449 = sbr.rel (%p446_p9) target bundleno = 2083 (0x823), region = 76  ;;  %vm4479_vm1 = vmpackc.low (!%p446_p9), %vm573_vm0, %vm573_vm0  ;;  %s5533_s0 = sld [smem:[#allocation8_spill]] (!%p446_p9)  ;;  %vm2128_vm5 = vcmask (!%p446_p9), 1044484   ;;  %vm2131_vm6 = vcmask (!%p446_p9), 1045509   ;;  %vm2134_vm7 = vcmask (!%p446_p9), 1046534   ;;  %vm2137_vm8 = vcmask (!%p446_p9), 1047559  }
  0x15   : > { %s5534_s2 = sld [smem:[#allocation10_spill]] (!%p446_p9)  ;;  %vm4339_vm9 = vmmov (!%p446_p9), 0   ;;  %s503_s21 = sand.u32 (!%p446_p9), 1, %s4327_s30  }
  0x16   : > { %s3591_s28 = sshll.u32 (!%p446_p9), %s4437_s17, 4  ;;  %s3395_s15 = scalar_lea.sflag (!%p446_p9), [#allocation3], %s503_s21 }
  0x1b   : > { %s4466_s25 = scalar_select %p505_p10, %s4437_s17, 1 }
  0x1c   : > { %s4340_s17 = smov [#allocation2]  }
  0x1d   : > { %s4469_s26 = sshll.u32 %s4466_s25, 7 }
  0x1e   : > { %s4475_s18 = scalar_lea.vmem %s5530_s1, %s4469_s26  ;;  %s4487_s27 = scalar_lea.vmem %s5533_s0, %s4469_s26 }
  0x1f   : > { %v541_v1 = vld [vmem:[%s4475_s18] sm:$0xff]  ;;  %v542_v2 = vld [vmem:[%s4475_s18 + $0x8] sm:$0xff]  ;;  %v543_v3 = vld [vmem:[%s4475_s18 + $0x10] sm:$0xff]  ;;  %s4707_s20 = scalar_lea.vmem %s5534_s2, %s4469_s26  ;;  %s3597_s2 = sshll.u32 %s4466_s25, 4 }
  0x20   : > { %v3949_v4 = vpack.c.bf16 %v542_v2, %v541_v1  ;;  %v544_v5 = vld [vmem:[%s4475_s18 + $0x18] sm:$0xff]  ;;  %v525_v6 = vld [vmem:[%s4487_s27] sm:$0xff]  ;;  %v527_v7 = vld [vmem:[%s4487_s27 + $0x10] sm:$0xff]  ;;  %s524_s22 = scalar_lea.vmem %s5507_s3, %s3597_s2  ;;  %s5462_s2 = scalar_lea.hbm %s5518_s14, %s3591_s28 }
  0x21   : > { %v3955_v8 = vpack.c.bf16 %v544_v5, %v543_v3  ;;  %3750 = vmatprep.mubr.msk.f32.mxu0 %vm573_vm0, %v525_v6  ;;  %3757 = vmatprep.mubr.msk.f32.mxu1 %vm573_vm0, %v527_v7  ;;  %v545_v9 = vld [vmem:[%s4475_s18 + $0x20] sm:$0xff]  ;;  %v546_v10 = vld [vmem:[%s4475_s18 + $0x28] sm:$0xff]  ;;  %v547_v11 = vld [vmem:[%s4475_s18 + $0x30] sm:$0xff] }
  0x22   : > { %3951 = vmatprep.subr.msk.bf16.mxu0 %vm4479_vm1, %v3949_v4  ;;  %v548_v12 = vld [vmem:[%s4475_s18 + $0x38] sm:$0xff]  ;;  %v3961_v13 = vpack.c.bf16 %v546_v10, %v545_v9  ;;  %v549_v15 = vld [vmem:[%s4475_s18 + $0x40] sm:$0xff]  ;;  %v550_v16 = vld [vmem:[%s4475_s18 + $0x48] sm:$0xff] }
  0x23   : > { %3957 = vmatprep.subr.msk.bf16.mxu1 %vm4479_vm1, %v3955_v8  ;;  %3954 = vmatpush3.bf16.xpose.msk.msra.mxu0 %vm4479_vm1, %v3949_v4  ;;  %v3967_v14 = vpack.c.bf16 %v548_v12, %v547_v11  ;;  %v526_v17 = vld [vmem:[%s4487_s27 + $0x8] sm:$0xff]  ;;  %v551_v18 = vld [vmem:[%s4475_s18 + $0x50] sm:$0xff]  ;;  %v552_v19 = vld [vmem:[%s4475_s18 + $0x58] sm:$0xff]  ;;  %v3973_v22 = vpack.c.bf16 %v550_v16, %v549_v15 }
  0x24   : > { %3960 = vmatpush3.bf16.xpose.msk.msra.mxu1 %vm4479_vm1, %v3955_v8  ;;  %3963 = vmatprep.subr.msk.bf16.mxu0 %vm4479_vm1, %v3961_v13  ;;  %v528_v20 = vld [vmem:[%s4487_s27 + $0x18] sm:$0xff]  ;;  %v529_v21 = vld [vmem:[%s4487_s27 + $0x20] sm:$0xff]  ;;  %v531_v23 = vld [vmem:[%s4487_s27 + $0x30] sm:$0xff]  ;;  %v3979_v24 = vpack.c.bf16 %v552_v19, %v551_v18 }
  0x25   : > { %3969 = vmatprep.subr.msk.bf16.mxu1 %vm4479_vm1, %v3967_v14  ;;  %v553_v25 = vld [vmem:[%s4475_s18 + $0x60] sm:$0xff]  ;;  %v554_v26 = vld [vmem:[%s4475_s18 + $0x68] sm:$0xff]  ;;  %v555_v28 = vld [vmem:[%s4475_s18 + $0x70] sm:$0xff] }
  0x26   : > { %v530_v27 = vld [vmem:[%s4487_s27 + $0x28] sm:$0xff]  ;;  %v556_v29 = vld [vmem:[%s4475_s18 + $0x78] sm:$0xff]  ;;  %v533_v31 = vld [vmem:[%s4487_s27 + $0x40] sm:$0xff]  ;;  %v3985_v32 = vpack.c.bf16 %v554_v26, %v553_v25  ;;  %s504_s18 = scalar_lea.vmem [#allocation2], %s503_s21 }
  0x27   : > { %v532_v30 = vld [vmem:[%s4487_s27 + $0x38] sm:$0xff]  ;;  %v535_v33 = vld [vmem:[%s4487_s27 + $0x50] sm:$0xff]  ;;  %v3991_v34 = vpack.c.bf16 %v556_v29, %v555_v28  ;;  %v534_v35 = vld [vmem:[%s4487_s27 + $0x48] sm:$0xff] }
  0x28   : > { %v536_v36 = vld [vmem:[%s4487_s27 + $0x58] sm:$0xff]  ;;  %v537_v37 = vld [vmem:[%s4487_s27 + $0x60] sm:$0xff]  ;;  %v539_v38 = vld [vmem:[%s4487_s27 + $0x70] sm:$0xff] }
  0x29   : > { %v538_v39 = vld [vmem:[%s4487_s27 + $0x68] sm:$0xff]  ;;  %v540_v40 = vld [vmem:[%s4487_s27 + $0x78] sm:$0xff] }
  0x2a   : > { %3751 = vmatmul.mubr.msk.f32.vlgmr.msra.gmra.mrb[0].mxu0 %vm573_vm0, %v526_v17 }
  0x2b   : > { %3758 = vmatmul.mubr.msk.f32.vlgmr.msra.gmra.mrb[0].mxu1 %vm573_vm0, %v528_v20  ;;  %3966 = vmatpush3.bf16.xpose.msk.msra.mxu0 %vm4479_vm1, %v3961_v13 }
  0x2c   : > { %3972 = vmatpush3.bf16.xpose.msk.msra.mxu1 %vm4479_vm1, %v3967_v14  ;;  %3764 = vmatprep.mubr.msk.f32.mxu0 %vm573_vm0, %v529_v21 }
  0x2d   : > { %3975 = vmatprep.subr.msk.bf16.mxu0 %vm4479_vm1, %v3973_v22  ;;  %3771 = vmatprep.mubr.msk.f32.mxu1 %vm573_vm0, %v531_v23 }
  0x2e   : > { %3981 = vmatprep.subr.msk.bf16.mxu1 %vm4479_vm1, %v3979_v24 }
  0x32   : > { %3765 = vmatmul.mubr.msk.f32.vlgmr.msra.gmra.mrb[2].mxu0 %vm573_vm0, %v530_v27 }
  0x33   : > { %3978 = vmatpush3.bf16.xpose.msk.msra.mxu0 %vm4479_vm1, %v3973_v22  ;;  %3772 = vmatmul.mubr.msk.f32.vlgmr.msra.gmra.mrb[2].mxu1 %vm573_vm0, %v532_v30 }
  0x34   : > { %3984 = vmatpush3.bf16.xpose.msk.msra.mxu1 %vm4479_vm1, %v3979_v24  ;;  %3778 = vmatprep.mubr.msk.f32.mxu0 %vm573_vm0, %v533_v31 }
  0x35   : > { %3987 = vmatprep.subr.msk.bf16.mxu0 %vm4479_vm1, %v3985_v32  ;;  %3785 = vmatprep.mubr.msk.f32.mxu1 %vm573_vm0, %v535_v33 }
  0x36   : > { %3993 = vmatprep.subr.msk.bf16.mxu1 %vm4479_vm1, %v3991_v34 }
  0x3a   : > { %3779 = vmatmul.mubr.msk.f32.vlgmr.msra.gmra.mrb[4].mxu0 %vm573_vm0, %v534_v35 }
  0x3b   : > { %3990 = vmatpush3.bf16.xpose.msk.msra.mxu0 %vm4479_vm1, %v3985_v32  ;;  %3786 = vmatmul.mubr.msk.f32.vlgmr.msra.gmra.mrb[4].mxu1 %vm573_vm0, %v536_v36 }
  0x3c   : > { %3996 = vmatpush3.bf16.xpose.msk.msra.mxu1 %vm4479_vm1, %v3991_v34  ;;  %3792 = vmatprep.mubr.msk.f32.mxu0 %vm573_vm0, %v537_v37 }
  0x3d   : > { %3799 = vmatprep.mubr.msk.f32.mxu1 %vm573_vm0, %v539_v38 }
  0x42   : > { %3793 = vmatmul.mubr.msk.f32.vlgmr.msra.gmra.mrb[6].mxu0 %vm573_vm0, %v538_v39 }
  0x43   : > { %3800 = vmatmul.mubr.msk.f32.vlgmr.msra.gmra.mrb[6].mxu1 %vm573_vm0, %v540_v40 }
  0xfd   : > { %v3752_v41 = vpop.f32.mrb[0].mxu0 }
  0xfe   : > { %v4569_v42 = vmul.f32 0.70710677, %v3752_v41  ;;  %v3759_v43 = vpop.f32.mrb[0].mxu1  ;;  %v652_v44 = vpop.f32.mrb[1].mxu0 }
  0xff   : > { %v4571_v45 = vmul.f32 0.70710677, %v3759_v43  ;;  %v739_v46 = vpop.f32.mrb[1].mxu1  ;;  %v4573_v47 = vmul.f32 0.70710677, %v652_v44 }
 0x100   : > { %v4575_v48 = vmul.f32 0.70710677, %v739_v46  ;;  %v1289_v49 = vsel %vm573_vm0, %v4569_v42, -inf }
 0x101   : > { %v1295_v50 = vsel %vm573_vm0, %v4571_v45, -inf  ;;  %1290 = vmax.xlane.f32.xlu0 %v1289_v49  ;;  %v1286_v52 = vsel %vm573_vm0, %v4573_v47, -inf }
 0x102   : > { %1296 = vmax.xlane.f32.xlu1 %v1295_v50  ;;  %v1292_v51 = vsel %vm573_vm0, %v4575_v48, -inf }
 0x105   : > { %1287 = vmax.xlane.f32.xlu0 %v1286_v52  ;;  %v3766_v53 = vpop.f32.mrb[2].mxu0 }
 0x106   : > { %1293 = vmax.xlane.f32.xlu1 %v1292_v51  ;;  %v4585_v54 = vmul.f32 0.70710677, %v3766_v53  ;;  %v826_v55 = vpop.f32.mrb[3].mxu0  ;;  %v3773_v56 = vpop.f32.mrb[2].mxu1 }
 0x107   : > { %v4587_v57 = vmul.f32 0.70710677, %v826_v55  ;;  %v4589_v58 = vmul.f32 0.70710677, %v3773_v56  ;;  %v913_v59 = vpop.f32.mrb[3].mxu1 }
 0x108   : > { %v1301_v60 = vsel %vm573_vm0, %v4585_v54, -inf  ;;  %v4593_v61 = vmul.f32 0.70710677, %v913_v59 }
 0x109   : > { %v1298_v62 = vsel %vm573_vm0, %v4587_v57, -inf  ;;  %v1307_v63 = vsel %vm573_vm0, %v4589_v58, -inf }
 0x10a   : > { %1302 = vmax.xlane.f32.xlu1 %v1301_v60  ;;  %1299 = vmax.xlane.f32.xlu0 %v1298_v62  ;;  %v1304_v0 = vsel %vm573_vm0, %v4593_v61, -inf }
 0x10d   : > { %v3780_v1 = vpop.f32.mrb[4].mxu0 }
 0x10e   : > { %1308 = vmax.xlane.f32.xlu1 %v1307_v63  ;;  %v4601_v2 = vmul.f32 0.70710677, %v3780_v1  ;;  %1305 = vmax.xlane.f32.xlu0 %v1304_v0  ;;  %v1000_v3 = vpop.f32.mrb[5].mxu0  ;;  %v3787_v4 = vpop.f32.mrb[4].mxu1 }
 0x10f   : > { %v4603_v5 = vmul.f32 0.70710677, %v1000_v3  ;;  %v4605_v6 = vmul.f32 0.70710677, %v3787_v4  ;;  %v1087_v7 = vpop.f32.mrb[5].mxu1 }
 0x110   : > { %v1313_v8 = vsel %vm573_vm0, %v4601_v2, -inf  ;;  %v4609_v9 = vmul.f32 0.70710677, %v1087_v7 }
 0x111   : > { %v1310_v10 = vsel %vm573_vm0, %v4603_v5, -inf  ;;  %v1319_v11 = vsel %vm573_vm0, %v4605_v6, -inf }
 0x112   : > { %1314 = vmax.xlane.f32.xlu1 %v1313_v8  ;;  %1311 = vmax.xlane.f32.xlu0 %v1310_v10  ;;  %v1316_v12 = vsel %vm573_vm0, %v4609_v9, -inf }
 0x115   : > { %v3794_v13 = vpop.f32.mrb[6].mxu0 }
 0x116   : > { %1320 = vmax.xlane.f32.xlu1 %v1319_v11  ;;  %v4617_v14 = vmul.f32 0.70710677, %v3794_v13  ;;  %1317 = vmax.xlane.f32.xlu0 %v1316_v12  ;;  %v1174_v15 = vpop.f32.mrb[7].mxu0  ;;  %v3801_v16 = vpop.f32.mrb[6].mxu1 }
 0x117   : > { %v4619_v17 = vmul.f32 0.70710677, %v1174_v15  ;;  %v4621_v18 = vmul.f32 0.70710677, %v3801_v16  ;;  %v1261_v19 = vpop.f32.mrb[7].mxu1 }
 0x118   : > { %v1325_v20 = vsel %vm573_vm0, %v4617_v14, -inf  ;;  %v4625_v21 = vmul.f32 0.70710677, %v1261_v19 }
 0x119   : > { %v1322_v22 = vsel %vm573_vm0, %v4619_v17, -inf  ;;  %v1331_v23 = vsel %vm573_vm0, %v4621_v18, -inf }
 0x11a   : > { %1326 = vmax.xlane.f32.xlu1 %v1325_v20  ;;  %1323 = vmax.xlane.f32.xlu0 %v1322_v22  ;;  %v1328_v24 = vsel %vm573_vm0, %v4625_v21, -inf }
 0x11e   : > { %1332 = vmax.xlane.f32.xlu1 %v1331_v23  ;;  %1329 = vmax.xlane.f32.xlu0 %v1328_v24 }
 0x18e   : > { %v1291_v25 = vpop.xlane.xlu0 %1290 }
 0x18f   : > { %v1297_v26 = vpop.xlane.xlu1 %1296  ;;  %v1335_v27 = vsub.f32 %v4569_v42, %v1291_v25 }
 0x190   : > { %v1337_v28 = vsub.f32 %v4571_v45, %v1297_v26 }
 0x191   : > { %v1352_v29 = vmul.f32 1.442695, %v1335_v27 }
 0x192   : > { %v1356_v30 = vmul.f32 1.442695, %v1337_v28  ;;  %v1288_v31 = vpop.xlane.xlu0 %1287 }
 0x193   : > { %4205 = vpow2.f32 %v1352_v29  ;;  %v1294_v32 = vpop.xlane.xlu1 %1293  ;;  %v1334_v33 = vsub.f32 %v4573_v47, %v1288_v31 }
 0x194   : > { %v1336_v34 = vsub.f32 %v4575_v48, %v1294_v32  ;;  %4207 = vpow2.f32 %v1356_v30 }
 0x195   : > { %v1350_v35 = vmul.f32 1.442695, %v1334_v33 }
 0x196   : > { %v1354_v36 = vmul.f32 1.442695, %v1336_v34 }
 0x197   : > { %4209 = vpow2.f32 %v1350_v35  ;;  %v1303_v37 = vpop.xlane.xlu1 %1302  ;;  %v1300_v38 = vpop.xlane.xlu0 %1299 }
 0x198   : > { %v1339_v39 = vsub.f32 %v4585_v54, %v1303_v37  ;;  %v1338_v40 = vsub.f32 %v4587_v57, %v1300_v38  ;;  %4211 = vpow2.f32 %v1354_v36  ;;  %v557_v36 = vld [vmem:[%s4707_s20] sm:$0xff]  ;;  %v558_v37 = vld [vmem:[%s4707_s20 + $0x8] sm:$0xff] }
 0x19a   : > { %v1360_v41 = vmul.f32 1.442695, %v1339_v39  ;;  %v1358_v42 = vmul.f32 1.442695, %v1338_v40  ;;  %v3997_v40 = vpack.c.bf16 %v558_v37, %v557_v36 }
 0x19b   : > { %v1309_v43 = vpop.xlane.xlu1 %1308  ;;  %v1306_v44 = vpop.xlane.xlu0 %1305 }
 0x19c   : > { %4213 = vpow2.f32 %v1360_v41  ;;  %v1341_v45 = vsub.f32 %v4589_v58, %v1309_v43  ;;  %v1340_v46 = vsub.f32 %v4593_v61, %v1306_v44  ;;  %3998 = vmatprep.subr.bf16.mxu0 %v3997_v40  ;;  %v559_v43 = vld [vmem:[%s4707_s20 + $0x10] sm:$0xff]  ;;  %v560_v44 = vld [vmem:[%s4707_s20 + $0x18] sm:$0xff] }
 0x19d   : > { %v4641_v47 = vpop.eup %4205  ;;  %4215 = vpow2.f32 %v1358_v42  ;;  %4000 = vmatpush3.bf16.msra.mxu0 %v3997_v40 }
 0x19e   : > { %v1364_v48 = vmul.f32 1.442695, %v1341_v45  ;;  %v1362_v49 = vmul.f32 1.442695, %v1340_v46  ;;  %v1385_v50 = vsel %vm573_vm0, %v4641_v47, 0.0  ;;  %v4645_v51 = vpop.eup %4207  ;;  %v4001_v46 = vpack.c.bf16 %v560_v44, %v559_v43 }
 0x19f   : > { %v1315_v52 = vpop.xlane.xlu1 %1314  ;;  %v1312_v53 = vpop.xlane.xlu0 %1311  ;;  %1386 = vadd.xlane.f32.xlu1 %v1385_v50  ;;  %v1391_v59 = vsel %vm573_vm0, %v4645_v51, 0.0 }
 0x1a0   : > { %4217 = vpow2.f32 %v1364_v48  ;;  %v1343_v54 = vsub.f32 %v4601_v2, %v1315_v52  ;;  %v1342_v55 = vsub.f32 %v4603_v5, %v1312_v53  ;;  %4002 = vmatprep.subr.bf16.mxu1 %v4001_v46  ;;  %v561_v48 = vld [vmem:[%s4707_s20 + $0x20] sm:$0xff]  ;;  %v563_v52 = vld [vmem:[%s4707_s20 + $0x30] sm:$0xff]  ;;  %v564_v53 = vld [vmem:[%s4707_s20 + $0x38] sm:$0xff] }
 0x1a1   : > { %v4649_v56 = vpop.eup %4209  ;;  %4219 = vpow2.f32 %v1362_v49  ;;  %4004 = vmatpush3.bf16.msra.mxu1 %v4001_v46  ;;  %v562_v49 = vld [vmem:[%s4707_s20 + $0x28] sm:$0xff] }
 0x1a2   : > { %v1368_v57 = vmul.f32 1.442695, %v1343_v54  ;;  %v1366_v58 = vmul.f32 1.442695, %v1342_v55  ;;  %v1382_v60 = vsel %vm573_vm0, %v4649_v56, 0.0  ;;  %v4655_v61 = vpop.eup %4211  ;;  %v4005_v50 = vpack.c.bf16 %v562_v49, %v561_v48 }
 0x1a3   : > { %v1321_v62 = vpop.xlane.xlu1 %1320  ;;  %v1318_v63 = vpop.xlane.xlu0 %1317  ;;  %1392 = vadd.xlane.f32.xlu1 %v1391_v59  ;;  %1383 = vadd.xlane.f32.xlu0 %v1382_v60  ;;  %v1388_v5 = vsel %vm573_vm0, %v4655_v61, 0.0  ;;  %v4009_v54 = vpack.c.bf16 %v564_v53, %v563_v52 }
 0x1a4   : > { %4221 = vpow2.f32 %v1368_v57  ;;  %v1345_v0 = vsub.f32 %v4605_v6, %v1321_v62  ;;  %v1344_v1 = vsub.f32 %v4609_v9, %v1318_v63  ;;  %4006 = vmatprep.subr.bf16.mxu0 %v4005_v50 }
 0x1a5   : > { %4223 = vpow2.f32 %v1366_v58  ;;  %4010 = vmatprep.subr.bf16.mxu1 %v4009_v54 }
 0x1a6   : > { %v4659_v2 = vpop.eup %4213  ;;  %v1372_v3 = vmul.f32 1.442695, %v1345_v0  ;;  %v1370_v4 = vmul.f32 1.442695, %v1344_v1  ;;  %v565_v1 = vld [vmem:[%s4707_s20 + $0x40] sm:$0xff] }
 0x1a7   : > { %v4663_v7 = vpop.eup %4215  ;;  %v1327_v8 = vpop.xlane.xlu1 %1326  ;;  %v1397_v10 = vsel %vm573_vm0, %v4659_v2, 0.0  ;;  %1389 = vadd.xlane.f32.xlu0 %v1388_v5 }
 0x1a8   : > { %v1324_v11 = vpop.xlane.xlu0 %1323  ;;  %4225 = vpow2.f32 %v1372_v3  ;;  %v1347_v6 = vsub.f32 %v4617_v14, %v1327_v8  ;;  %1398 = vadd.xlane.f32.xlu1 %v1397_v10  ;;  %v1394_v16 = vsel %vm573_vm0, %v4663_v7, 0.0  ;;  %v566_v3 = vld [vmem:[%s4707_s20 + $0x48] sm:$0xff] }
 0x1a9   : > { %v1346_v9 = vsub.f32 %v4619_v17, %v1324_v11  ;;  %4227 = vpow2.f32 %v1370_v4 }
 0x1aa   : > { %v4669_v12 = vpop.eup %4217  ;;  %v1376_v13 = vmul.f32 1.442695, %v1347_v6 }
 0x1ab   : > { %v1374_v15 = vmul.f32 1.442695, %v1346_v9  ;;  %v4673_v19 = vpop.eup %4219  ;;  %v1333_v20 = vpop.xlane.xlu1 %1332  ;;  %v1403_v22 = vsel %vm573_vm0, %v4669_v12, 0.0  ;;  %1395 = vadd.xlane.f32.xlu0 %v1394_v16  ;;  %v4013_v9 = vpack.c.bf16 %v566_v3, %v565_v1 }
 0x1ac   : > { %v1330_v23 = vpop.xlane.xlu0 %1329  ;;  %4229 = vpow2.f32 %v1376_v13  ;;  %v1349_v14 = vsub.f32 %v4621_v18, %v1333_v20  ;;  %1404 = vadd.xlane.f32.xlu1 %v1403_v22  ;;  %v1400_v27 = vsel %vm573_vm0, %v4673_v19, 0.0  ;;  %v567_v13 = vld [vmem:[%s4707_s20 + $0x50] sm:$0xff] }
 0x1ad   : > { %v1348_v17 = vsub.f32 %v4625_v21, %v1330_v23  ;;  %4231 = vpow2.f32 %v1374_v15  ;;  %v568_v15 = vld [vmem:[%s4707_s20 + $0x58] sm:$0xff] }
 0x1ae   : > { %v4679_v24 = vpop.eup %4221  ;;  %v1380_v25 = vmul.f32 1.442695, %v1349_v14 }
 0x1af   : > { %v1378_v26 = vmul.f32 1.442695, %v1348_v17  ;;  %v4683_v28 = vpop.eup %4223  ;;  %v1409_v29 = vsel %vm573_vm0, %v4679_v24, 0.0  ;;  %1401 = vadd.xlane.f32.xlu0 %v1400_v27  ;;  %v569_v17 = vld [vmem:[%s4707_s20 + $0x60] sm:$0xff] }
 0x1b0   : > { %4233 = vpow2.f32 %v1380_v25  ;;  %1410 = vadd.xlane.f32.xlu1 %v1409_v29  ;;  %v1406_v21 = vsel %vm573_vm0, %v4683_v28, 0.0  ;;  %v570_v25 = vld [vmem:[%s4707_s20 + $0x68] sm:$0xff] }
 0x1b1   : > { %4235 = vpow2.f32 %v1378_v26 }
 0x1b2   : > { %v4687_v18 = vpop.eup %4225 }
 0x1b3   : > { %v4691_v30 = vpop.eup %4227  ;;  %v1415_v31 = vsel %vm573_vm0, %v4687_v18, 0.0  ;;  %1407 = vadd.xlane.f32.xlu0 %v1406_v21  ;;  %v4021_v21 = vpack.c.bf16 %v570_v25, %v569_v17 }
 0x1b4   : > { %1416 = vadd.xlane.f32.xlu1 %v1415_v31  ;;  %v1412_v33 = vsel %vm573_vm0, %v4691_v30, 0.0 }
 0x1b6   : > { %v4695_v32 = vpop.eup %4229 }
 0x1b7   : > { %v4699_v34 = vpop.eup %4231  ;;  %v1421_v35 = vsel %vm573_vm0, %v4695_v32, 0.0  ;;  %1413 = vadd.xlane.f32.xlu0 %v1412_v33  ;;  %v571_v33 = vld [vmem:[%s4707_s20 + $0x70] sm:$0xff] }
 0x1b8   : > { %1422 = vadd.xlane.f32.xlu1 %v1421_v35  ;;  %v1418_v39 = vsel %vm573_vm0, %v4699_v34, 0.0  ;;  %v572_v35 = vld [vmem:[%s4707_s20 + $0x78] sm:$0xff]  ;;  %s3407_s20 = sshll.u32 %s504_s18, 4  ;;  %s5464_s20 = int_to_ptr.vmem [resolvable:$true] %s3407_s20 }
 0x1b9   : > { %v4025_v40 = vpack.c.bf16 %v572_v35, %v571_v33  ;;  %s4273_s19 = scalar_lea.vmem %s5464_s20, 16 }
 0x1ba   : > { %v4711_v38 = vpop.eup %4233  ;;  %p4274_p11 = scmp.ne.s32.totalorder %s5464_s20, %s4273_s19 }
 0x1bb   : > { %v4715_v41 = vpop.eup %4235  ;;  %v1427_v42 = vsel %vm573_vm0, %v4711_v38, 0.0  ;;  %1419 = vadd.xlane.f32.xlu0 %v1418_v39 }
 0x1bc   : > { %1428 = vadd.xlane.f32.xlu1 %v1427_v42  ;;  %v1424_v45 = vsel %vm573_vm0, %v4715_v41, 0.0  ;;  %p4275_p12 = pnand %p4274_p11, %p4454_p5 }
 0x1be   : > { %p4276_p13 = pneg %p4275_p12 }
 0x1bf   : > { %1425 = vadd.xlane.f32.xlu0 %v1424_v45 }
 0x22c   : > { %v1387_v55 = vpop.xlane.xlu1 %1386 }
 0x22d   : > { %4237 = vrcp.f32 %v1387_v55 }
 0x230   : > { %v1393_v57 = vpop.xlane.xlu1 %1392  ;;  %v1384_v58 = vpop.xlane.xlu0 %1383 }
 0x231   : > { %4239 = vrcp.f32 %v1384_v58  ;;  %v3564_v58 = vld [vmem:[%s5508_s4 + $0x20] sm:$0xff] }
 0x232   : > { %4241 = vrcp.f32 %v1393_v57 }
 0x234   : > { %v1390_v59 = vpop.xlane.xlu0 %1389 }
 0x235   : > { %v1399_v60 = vpop.xlane.xlu1 %1398  ;;  %4243 = vrcp.f32 %v1390_v59  ;;  %v3565_v59 = vld [vmem:[%s5508_s4 + $0x28] sm:$0xff] }
 0x236   : > { %4245 = vrcp.f32 %v1399_v60  ;;  %v3568_v60 = vld [vmem:[%s5508_s4 + $0x30] sm:$0xff]  ;;  %v4802_v3 = vpack.c.bf16 %v3565_v59, %v3564_v58 }
 0x237   : > { %v4238_v0 = vpop.eup %4237 }
 0x238   : > { %v1396_v62 = vpop.xlane.xlu0 %1395  ;;  %v1447_v6 = vmul.f32 %v4238_v0, %v4641_v47  ;;  %v4017_v47 = vpack.c.bf16 %v568_v15, %v567_v13  ;;  %v3573_v0 = vld [vmem:[%s5508_s4 + $0x48] sm:$0xff] }
 0x239   : > { %v1405_v63 = vpop.xlane.xlu1 %1404  ;;  %4247 = vrcp.f32 %v1396_v62  ;;  %v3569_v62 = vld [vmem:[%s5508_s4 + $0x38] sm:$0xff] }
 0x23a   : > { %4249 = vrcp.f32 %v1405_v63  ;;  %v3572_v63 = vld [vmem:[%s5508_s4 + $0x40] sm:$0xff] }
 0x23b   : > { %v4240_v4 = vpop.eup %4239 }
 0x23c   : > { %v1402_v5 = vpop.xlane.xlu0 %1401  ;;  %v1446_v10 = vmul.f32 %v4240_v4, %v4649_v56  ;;  %v4242_v11 = vpop.eup %4241  ;;  %v4804_v4 = vpack.c.bf16 %v3569_v62, %v3568_v60 }
 0x23d   : > { %v1411_v8 = vpop.xlane.xlu1 %1410  ;;  %4251 = vrcp.f32 %v1402_v5  ;;  %v1449_v23 = vmul.f32 %v4242_v11, %v4645_v51  ;;  %v4806_v5 = vpack.c.bf16 %v3573_v0, %v3572_v63 }
 0x23e   : > { %3806 = vmatprep.mubr.msk.f32.mxu0 %vm573_vm0, %v1446_v10  ;;  %4253 = vrcp.f32 %v1411_v8 }
 0x23f   : > { %v4244_v16 = vpop.eup %4243  ;;  %3807 = vmatmul.mubr.msk.f32.vlgmr.msra.gmra.mrb[8].mxu0 %vm573_vm0, %v1447_v6 }
 0x240   : > { %v1408_v20 = vpop.xlane.xlu0 %1407  ;;  %v1448_v22 = vmul.f32 %v4244_v16, %v4655_v61  ;;  %4008 = vmatpush3.bf16.msra.mxu0 %v4005_v50  ;;  %v4246_v14 = vpop.eup %4245 }
 0x241   : > { %v1417_v56 = vpop.xlane.xlu1 %1416  ;;  %4255 = vrcp.f32 %v1408_v20  ;;  %4014 = vmatprep.subr.bf16.mxu0 %v4013_v9  ;;  %v1451_v51 = vmul.f32 %v4246_v14, %v4659_v2 }
 0x242   : > { %3813 = vmatprep.mubr.msk.f32.mxu1 %vm573_vm0, %v1448_v22  ;;  %4257 = vrcp.f32 %v1417_v56 }
 0x243   : > { %v4248_v26 = vpop.eup %4247  ;;  %3814 = vmatmul.mubr.msk.f32.vlgmr.msra.gmra.mrb[8].mxu1 %vm573_vm0, %v1449_v23 }
 0x244   : > { %v1414_v27 = vpop.xlane.xlu0 %1413  ;;  %v1450_v61 = vmul.f32 %v4248_v26, %v4663_v7  ;;  %4012 = vmatpush3.bf16.msra.mxu1 %v4009_v54  ;;  %v4250_v31 = vpop.eup %4249 }
 0x245   : > { %v1423_v29 = vpop.xlane.xlu1 %1422  ;;  %4259 = vrcp.f32 %v1414_v27  ;;  %4018 = vmatprep.subr.bf16.mxu1 %v4017_v47  ;;  %v1453_v7 = vmul.f32 %v4250_v31, %v4669_v12 }
 0x246   : > { %3820 = vmatprep.mubr.msk.f32.mxu0 %vm573_vm0, %v1450_v61  ;;  %4261 = vrcp.f32 %v1423_v29 }
 0x247   : > { %v4252_v36 = vpop.eup %4251  ;;  %3821 = vmatmul.mubr.msk.f32.vlgmr.msra.gmra.mrb[10].mxu0 %vm573_vm0, %v1451_v51 }
 0x248   : > { %v1420_v37 = vpop.xlane.xlu0 %1419  ;;  %v1452_v39 = vmul.f32 %v4252_v36, %v4673_v19  ;;  %4016 = vmatpush3.bf16.msra.mxu0 %v4013_v9  ;;  %v4254_v42 = vpop.eup %4253 }
 0x249   : > { %v1429_v2 = vpop.xlane.xlu1 %1428  ;;  %4263 = vrcp.f32 %v1420_v37  ;;  %4022 = vmatprep.subr.bf16.mxu0 %v4021_v21  ;;  %v1455_v19 = vmul.f32 %v4254_v42, %v4679_v24 }
 0x24a   : > { %3827 = vmatprep.mubr.msk.f32.mxu1 %vm573_vm0, %v1452_v39  ;;  %4265 = vrcp.f32 %v1429_v2 }
 0x24b   : > { %v4256_v43 = vpop.eup %4255  ;;  %3828 = vmatmul.mubr.msk.f32.vlgmr.msra.gmra.mrb[10].mxu1 %vm573_vm0, %v1453_v7 }
 0x24c   : > { %v1426_v44 = vpop.xlane.xlu0 %1425  ;;  %v1454_v45 = vmul.f32 %v4256_v43, %v4683_v28  ;;  %4020 = vmatpush3.bf16.msra.mxu1 %v4017_v47  ;;  %v4258_v12 = vpop.eup %4257 }
 0x24d   : > { %4267 = vrcp.f32 %v1426_v44  ;;  %4026 = vmatprep.subr.bf16.mxu1 %v4025_v40  ;;  %v1457_v49 = vmul.f32 %v4258_v12, %v4687_v18 }
 0x24e   : > { %3834 = vmatprep.mubr.msk.f32.mxu0 %vm573_vm0, %v1454_v45 }
 0x24f   : > { %v4260_v46 = vpop.eup %4259  ;;  %3835 = vmatmul.mubr.msk.f32.vlgmr.msra.gmra.mrb[12].mxu0 %vm573_vm0, %v1455_v19 }
 0x250   : > { %v1456_v48 = vmul.f32 %v4260_v46, %v4691_v30  ;;  %4024 = vmatpush3.bf16.msra.mxu0 %v4021_v21  ;;  %v4262_v50 = vpop.eup %4261 }
 0x251   : > { %v1459_v52 = vmul.f32 %v4262_v50, %v4695_v32  ;;  %v3559_v32 = vld [vmem:[%s5508_s4 + $0x18] sm:$0xff] }
 0x252   : > { %3841 = vmatprep.mubr.msk.f32.mxu1 %vm573_vm0, %v1456_v48 }
 0x253   : > { %v4264_v28 = vpop.eup %4263  ;;  %3842 = vmatmul.mubr.msk.f32.vlgmr.msra.gmra.mrb[12].mxu1 %vm573_vm0, %v1457_v49 }
 0x254   : > { %v1458_v24 = vmul.f32 %v4264_v28, %v4699_v34  ;;  %4028 = vmatpush3.bf16.msra.mxu1 %v4025_v40  ;;  %v4266_v53 = vpop.eup %4265  ;;  %v3558_v34 = vld [vmem:[%s5508_s4 + $0x10] sm:$0xff] }
 0x255   : > { %v1461_v18 = vmul.f32 %v4266_v53, %v4711_v38  ;;  %v4029_v55 = vpack.c.bf16 %v3559_v32, %v3558_v34  ;;  %v2162_v38 = vld [vmem:[%s5508_s4 + $0x8] sm:$0xff] }
 0x256   : > { %3848 = vmatprep.mubr.msk.f32.mxu0 %vm573_vm0, %v1458_v24 }
 0x257   : > { %v4268_v54 = vpop.eup %4267  ;;  %3849 = vmatmul.mubr.msk.f32.vlgmr.msra.gmra.mrb[14].mxu0 %vm573_vm0, %v1459_v52  ;;  %4030 = vmatprep.subr.bf16.mxu0 %v4029_v55 }
 0x258   : > { %v1460_v30 = vmul.f32 %v4268_v54, %v4715_v41  ;;  %4032 = vmatpush3.bf16.msra.mxu0 %v4029_v55  ;;  %v2161_v41 = vld [vmem:[%s5508_s4] sm:$0xff] }
 0x259   : > { %v4779_v57 = vpack.c.bf16 %v2162_v38, %v2161_v41 }
 0x25a   : > { %3855 = vmatprep.mubr.msk.f32.mxu1 %vm573_vm0, %v1460_v30 }
 0x25b   : > { %3856 = vmatmul.mubr.msk.f32.vlgmr.msra.gmra.mrb[14].mxu1 %vm573_vm0, %v1461_v18  ;;  %4034 = vmatprep.subr.bf16.mxu0 %v4779_v57 }
 0x312   : > { %v4800_v1 = vpop.f32.mrb[8].mxu0 }
 0x313   : > { %v2177_v8 = vrot.slane %v4800_v1, 1  ;;  %v2366_v10 = vrot.slane %v4800_v1, 2  ;;  %v2478_v11 = vrot.slane %v4800_v1, 3  ;;  %v2590_v6 = vrot.slane %v4800_v1, 4  ;;  %v4812_v9 = vpop.f32.mrb[9].mxu0 }
 0x314   : > { %v2702_v13 = vrot.slane %v4800_v1, 5  ;;  %v2814_v15 = vrot.slane %v4800_v1, 6  ;;  %v2926_v16 = vrot.slane %v4800_v1, 7  ;;  %v2163_v20 = vrot.slane %v4812_v9, 1 }
 0x315   : > { %v2352_v22 = vrot.slane %v4812_v9, 2  ;;  %v2464_v23 = vrot.slane %v4812_v9, 3  ;;  %v2576_v56 = vrot.slane %v4812_v9, 4  ;;  %v2688_v47 = vrot.slane %v4812_v9, 5 }
 0x316   : > { %v4822_v14 = vpop.f32.mrb[8].mxu1  ;;  %v2800_v17 = vrot.slane %v4812_v9, 6  ;;  %v2912_v25 = vrot.slane %v4812_v9, 7 }
 0x317   : > { %v2147_v26 = vrot.slane %v4822_v14, 7  ;;  %v2367_v27 = vrot.slane %v4822_v14, 1  ;;  %v4828_v61 = vpop.f32.mrb[9].mxu1  ;;  %v2479_v51 = vrot.slane %v4822_v14, 2  ;;  %v2591_v29 = vrot.slane %v4822_v14, 3 }
 0x318   : > { %v2703_v21 = vrot.slane %v4822_v14, 4  ;;  %v2815_v31 = vrot.slane %v4822_v14, 5  ;;  %v2927_v33 = vrot.slane %v4822_v14, 6  ;;  %v2118_v35 = vrot.slane %v4828_v61, 7 }
 0x319   : > { %v2353_v36 = vrot.slane %v4828_v61, 1  ;;  %v2465_v37 = vrot.slane %v4828_v61, 2  ;;  %v2577_v39 = vrot.slane %v4828_v61, 3  ;;  %v2689_v7 = vrot.slane %v4828_v61, 4 }
 0x31a   : > { %v2801_v2 = vrot.slane %v4828_v61, 5  ;;  %v2913_v40 = vrot.slane %v4828_v61, 6  ;;  %v4842_v42 = vpop.f32.mrb[10].mxu0  ;;  %v2164_v50 = vsel %vm2119_vm2, %v4828_v61, %v2163_v20  ;;  %v2178_v24 = vsel %vm2119_vm2, %v4822_v14, %v2177_v8 }
 0x31b   : > { %v2149_v43 = vrot.slane %v4842_v42, 6  ;;  %v2179_v44 = vrot.slane %v4842_v42, 7  ;;  %v2481_v45 = vrot.slane %v4842_v42, 1  ;;  %v2593_v19 = vrot.slane %v4842_v42, 2  ;;  %v4848_v12 = vpop.f32.mrb[11].mxu0 }
 0x31c   : > { %v2705_v46 = vrot.slane %v4842_v42, 3  ;;  %v2817_v48 = vrot.slane %v4842_v42, 4  ;;  %v2929_v49 = vrot.slane %v4842_v42, 5  ;;  %v2165_v28 = vrot.slane %v4848_v12, 7 }
 0x31d   : > { %v2120_v52 = vsel %vm2119_vm2, %v2118_v35, %v4812_v9  ;;  %v2121_v53 = vrot.slane %v4848_v12, 6  ;;  %v2180_v30 = vsel %vm2122_vm3, %v2179_v44, %v2178_v24  ;;  %v2148_v18 = vsel %vm2119_vm2, %v2147_v26, %v4800_v1 }
 0x31e   : > { %v4861_v54 = vpop.f32.mrb[10].mxu1  ;;  %v2354_v34 = vsel %vm2119_vm2, %v2353_v36, %v2352_v22  ;;  %v2368_v32 = vsel %vm2119_vm2, %v2367_v27, %v2366_v10  ;;  %v2166_v41 = vsel %vm2122_vm3, %v2165_v28, %v2164_v50  ;;  %v2150_v59 = vsel %vm2122_vm3, %v2149_v43, %v2148_v18 }
 0x31f   : > { %v4868_v55 = vpop.f32.mrb[11].mxu1  ;;  %v2181_v38 = vrot.slane %v4861_v54, 6  ;;  %v2123_v58 = vsel %vm2122_vm3, %v2121_v53, %v2120_v52  ;;  %v2151_v63 = vrot.slane %v4861_v54, 5  ;;  %v2355_v0 = vsel %vm2122_vm3, %v4848_v12, %v2354_v34 }
 0x320   : > { %v2167_v60 = vrot.slane %v4868_v55, 6  ;;  %v2124_v62 = vrot.slane %v4868_v55, 5  ;;  %v2356_v10 = vrot.slane %v4868_v55, 7  ;;  %v2369_v20 = vsel %vm2122_vm3, %v4842_v42, %v2368_v32 }
 0x321   : > { %v2182_v8 = vsel %vm2125_vm4, %v2181_v38, %v2180_v30  ;;  %v2370_v22 = vrot.slane %v4861_v54, 7  ;;  %v2152_v36 = vsel %vm2125_vm4, %v2151_v63, %v2150_v59  ;;  %v2466_v43 = vsel %vm2119_vm2, %v2465_v37, %v2464_v23 }
 0x322   : > { %v4884_v26 = vpop.f32.mrb[12].mxu0  ;;  %v2168_v27 = vsel %vm2125_vm4, %v2167_v60, %v2166_v41  ;;  %v2126_v35 = vsel %vm2125_vm4, %v2124_v62, %v2123_v58  ;;  %v2357_v24 = vsel %vm2125_vm4, %v2356_v10, %v2355_v0  ;;  %v2467_v32 = vrot.slane %v4848_v12, 1 }
 0x323   : > { %v4890_v44 = vpop.f32.mrb[13].mxu0  ;;  %v2183_v50 = vrot.slane %v4884_v26, 5  ;;  %v2153_v28 = vrot.slane %v4884_v26, 4  ;;  %v2371_v52 = vsel %vm2125_vm4, %v2370_v22, %v2369_v20  ;;  %v2372_v34 = vrot.slane %v4884_v26, 6 }
 0x324   : > { %v2169_v53 = vrot.slane %v4890_v44, 5  ;;  %v2127_v30 = vrot.slane %v4890_v44, 4  ;;  %v2358_v18 = vrot.slane %v4890_v44, 6  ;;  %v2470_v41 = vrot.slane %v4890_v44, 7 }
 0x325   : > { %v2184_v23 = vsel %vm2128_vm5, %v2183_v50, %v2182_v8  ;;  %v2154_v37 = vsel %vm2128_vm5, %v2153_v28, %v2152_v36  ;;  %v2373_v62 = vsel %vm2128_vm5, %v2372_v34, %v2371_v52  ;;  %v2468_v20 = vsel %vm2122_vm3, %v2467_v32, %v2466_v43 }
 0x326   : > { %v4904_v38 = vpop.f32.mrb[12].mxu1  ;;  %v2170_v58 = vsel %vm2128_vm5, %v2169_v53, %v2168_v27  ;;  %v2129_v59 = vsel %vm2128_vm5, %v2127_v30, %v2126_v35  ;;  %v2359_v60 = vsel %vm2128_vm5, %v2358_v18, %v2357_v24  ;;  %v2469_v36 = vsel %vm2125_vm4, %v4868_v55, %v2468_v20 }
 0x327   : > { %v4910_v63 = vpop.f32.mrb[13].mxu1  ;;  %v2185_v0 = vrot.slane %v4904_v38, 4  ;;  %v2155_v8 = vrot.slane %v4904_v38, 3  ;;  %v2374_v10 = vrot.slane %v4904_v38, 5  ;;  %v2471_v52 = vsel %vm2128_vm5, %v2470_v41, %v2469_v36 }
 0x328   : > { %v2171_v22 = vrot.slane %v4910_v63, 4  ;;  %v2130_v27 = vrot.slane %v4910_v63, 3  ;;  %v2360_v35 = vrot.slane %v4910_v63, 5  ;;  %v2472_v34 = vrot.slane %v4910_v63, 6 }
 0x329   : > { %v2186_v50 = vsel %vm2131_vm6, %v2185_v0, %v2184_v23  ;;  %v2156_v28 = vsel %vm2131_vm6, %v2155_v8, %v2154_v37  ;;  %v2375_v24 = vsel %vm2131_vm6, %v2374_v10, %v2373_v62  ;;  %v2480_v41 = vsel %vm2119_vm2, %v2479_v51, %v2478_v11 }
 0x32a   : > { %v4925_v53 = vpop.f32.mrb[14].mxu0  ;;  %v2172_v43 = vsel %vm2131_vm6, %v2171_v22, %v2170_v58  ;;  %v2132_v30 = vsel %vm2131_vm6, %v2130_v27, %v2129_v59  ;;  %v2361_v18 = vsel %vm2131_vm6, %v2360_v35, %v2359_v60  ;;  %v2473_v0 = vsel %vm2131_vm6, %v2472_v34, %v2471_v52 }
 0x32b   : > { %v4931_v32 = vpop.f32.mrb[15].mxu0  ;;  %v2187_v23 = vrot.slane %v4925_v53, 3  ;;  %v2157_v37 = vrot.slane %v4925_v53, 2  ;;  %v2376_v62 = vrot.slane %v4925_v53, 4  ;;  %v2482_v36 = vsel %vm2122_vm3, %v2481_v45, %v2480_v41 }
 0x32c   : > { %v2173_v58 = vrot.slane %v4931_v32, 3  ;;  %v2133_v59 = vrot.slane %v4931_v32, 2  ;;  %v2362_v60 = vrot.slane %v4931_v32, 4  ;;  %v2474_v22 = vrot.slane %v4931_v32, 5 }
 0x32d   : > { %v2188_v8 = vsel %vm2134_vm7, %v2187_v23, %v2186_v50  ;;  %v2158_v10 = vsel %vm2134_vm7, %v2157_v37, %v2156_v28  ;;  %v2377_v20 = vsel %vm2134_vm7, %v2376_v62, %v2375_v24  ;;  %v2483_v41 = vsel %vm2125_vm4, %v4861_v54, %v2482_v36 }
 0x32e   : > { %v4949_v27 = vpop.f32.mrb[14].mxu1  ;;  %v2174_v11 = vsel %vm2134_vm7, %v2173_v58, %v2172_v43  ;;  %v2135_v51 = vsel %vm2134_vm7, %v2133_v59, %v2132_v30  ;;  %v2363_v35 = vsel %vm2134_vm7, %v2362_v60, %v2361_v18  ;;  %v2475_v34 = vsel %vm2134_vm7, %v2474_v22, %v2473_v0 }
 0x32f   : > { %v4957_v52 = vpop.f32.mrb[15].mxu1  ;;  %v2189_v50 = vrot.slane %v4949_v27, 2  ;;  %v2159_v28 = vrot.slane %v4949_v27, 1  ;;  %v2378_v24 = vrot.slane %v4949_v27, 3  ;;  %v2490_v22 = vrot.slane %v4949_v27, 4 }
 0x330   : > { %v2175_v43 = vrot.slane %v4957_v52, 2  ;;  %v2136_v30 = vrot.slane %v4957_v52, 1  ;;  %v2364_v18 = vrot.slane %v4957_v52, 3  ;;  %v2476_v23 = vrot.slane %v4957_v52, 4 }
 0x331   : > { %v2190_v45 = vsel %vm2137_vm8, %v2189_v50, %v2188_v8  ;;  %v2160_v37 = vsel %vm2137_vm8, %v2159_v28, %v2158_v10  ;;  %v4970_v62 = vsel %vm2137_vm8, %v2378_v24, %v2377_v20  ;;  %v2484_v8 = vrot.slane %v4884_v26, 7 }
 0x332   : > { %v2176_v58 = vsel %vm2137_vm8, %v2175_v43, %v2174_v11  ;;  %v2138_v59 = vsel %vm2137_vm8, %v2136_v30, %v2135_v51  ;;  %v2365_v60 = vsel %vm2137_vm8, %v2364_v18, %v2363_v35  ;;  %v4978_v0 = vsel %vm2137_vm8, %v2476_v23, %v2475_v34 }
 0x333   : > { %3862 = vmatprep.mubr.msk.f32.mxu0 %vm573_vm0, %v2176_v58  ;;  %v2486_v10 = vrot.slane %v4904_v38, 6  ;;  %v2488_v20 = vrot.slane %v4925_v53, 5  ;;  %v2578_v11 = vsel %vm2119_vm2, %v2577_v39, %v2576_v56  ;;  %v2579_v51 = vrot.slane %v4848_v12, 2 }
 0x334   : > { %3863 = vmatmul.mubr.msk.f32.vlgmr.msra.gmra.mrb[16].mxu0 %vm573_vm0, %v2190_v45  ;;  %v2581_v35 = vrot.slane %v4868_v55, 1  ;;  %v2584_v36 = vrot.slane %v4910_v63, 7  ;;  %v2485_v50 = vsel %vm2128_vm5, %v2484_v8, %v2483_v41  ;;  %v2586_v28 = vrot.slane %v4931_v32, 6 }
 0x335   : > { %4036 = vmatpush3.bf16.msra.mxu0 %v4779_v57  ;;  %3869 = vmatprep.mubr.msk.f32.mxu0 %vm573_vm0, %v2138_v59  ;;  %v2588_v24 = vrot.slane %v4957_v52, 5  ;;  %v2592_v56 = vsel %vm2119_vm2, %v2591_v29, %v2590_v6  ;;  %v2487_v39 = vsel %vm2131_vm6, %v2486_v10, %v2485_v50  ;;  %v2580_v57 = vsel %vm2122_vm3, %v2579_v51, %v2578_v11 }
 0x336   : > { %4038 = vmatprep.subr.bf16.mxu0 %v4802_v3  ;;  %v2594_v34 = vsel %vm2122_vm3, %v2593_v19, %v2592_v56  ;;  %v2595_v43 = vrot.slane %v4861_v54, 1  ;;  %v2489_v30 = vsel %vm2134_vm7, %v2488_v20, %v2487_v39  ;;  %v2582_v18 = vsel %vm2125_vm4, %v2581_v35, %v2580_v57 }
 0x337   : > { %v2598_v23 = vrot.slane %v4904_v38, 7  ;;  %v2600_v6 = vrot.slane %v4925_v53, 6  ;;  %v5016_v29 = vsel %vm2137_vm8, %v2490_v22, %v2489_v30  ;;  %v2583_v45 = vsel %vm2128_vm5, %v4890_v44, %v2582_v18 }
 0x338   : > { %v2596_v41 = vsel %vm2125_vm4, %v2595_v43, %v2594_v34  ;;  %v2602_v19 = vrot.slane %v4949_v27, 5  ;;  %v2585_v58 = vsel %vm2131_vm6, %v2584_v36, %v2583_v45  ;;  %v2690_v8 = vsel %vm2119_vm2, %v2689_v7, %v2688_v47 }
 0x339   : > { %v2597_v59 = vsel %vm2128_vm5, %v4884_v26, %v2596_v41  ;;  %v2691_v10 = vrot.slane %v4848_v12, 3  ;;  %v2587_v20 = vsel %vm2134_vm7, %v2586_v28, %v2585_v58  ;;  %v2693_v11 = vrot.slane %v4868_v55, 2 }
 0x33a   : > { %v2599_v22 = vsel %vm2131_vm6, %v2598_v23, %v2597_v59  ;;  %v2695_v51 = vrot.slane %v4890_v44, 1  ;;  %v5036_v35 = vsel %vm2137_vm8, %v2588_v24, %v2587_v20  ;;  %v2698_v56 = vrot.slane %v4931_v32, 7 }
 0x33b   : > { %v2601_v36 = vsel %vm2134_vm7, %v2600_v6, %v2599_v22  ;;  %v2692_v50 = vsel %vm2122_vm3, %v2691_v10, %v2690_v8  ;;  %v2700_v28 = vrot.slane %v4957_v52, 6  ;;  %v2704_v24 = vsel %vm2119_vm2, %v2703_v21, %v2702_v13 }
 0x33c   : > { %3870 = vmatmul.mubr.msk.f32.vlgmr.msra.gmra.mrb[16].mxu0 %vm573_vm0, %v2160_v37  ;;  %v5043_v47 = vsel %vm2137_vm8, %v2602_v19, %v2601_v36  ;;  %v2694_v7 = vsel %vm2125_vm4, %v2693_v11, %v2692_v50  ;;  %v2706_v37 = vsel %vm2122_vm3, %v2705_v46, %v2704_v24  ;;  %v2707_v57 = vrot.slane %v4861_v54, 2 }
 0x33d   : > { %4040 = vmatpush3.bf16.msra.mxu0 %v4802_v3  ;;  %3876 = vmatprep.mubr.msk.f32.mxu0 %vm573_vm0, %v2365_v60  ;;  %v2696_v39 = vsel %vm2128_vm5, %v2695_v51, %v2694_v7  ;;  %v2709_v34 = vrot.slane %v4884_v26, 1  ;;  %v2712_v13 = vrot.slane %v4925_v53, 7  ;;  %v2714_v3 = vrot.slane %v4949_v27, 6 }
 0x33e   : > { %4042 = vmatprep.subr.bf16.mxu0 %v4804_v4  ;;  %v2697_v43 = vsel %vm2131_vm6, %v4910_v63, %v2696_v39  ;;  %v2802_v21 = vsel %vm2119_vm2, %v2801_v2, %v2800_v17  ;;  %v2708_v60 = vsel %vm2125_vm4, %v2707_v57, %v2706_v37  ;;  %v2803_v30 = vrot.slane %v4848_v12, 4 }
 0x33f   : > { %v2699_v46 = vsel %vm2134_vm7, %v2698_v56, %v2697_v43  ;;  %v2805_v18 = vrot.slane %v4868_v55, 3  ;;  %v2710_v6 = vsel %vm2128_vm5, %v2709_v34, %v2708_v60  ;;  %v2807_v45 = vrot.slane %v4890_v44, 2 }
 0x340   : > { %v5075_v23 = vsel %vm2137_vm8, %v2700_v28, %v2699_v46  ;;  %v2809_v41 = vrot.slane %v4910_v63, 1  ;;  %v2711_v17 = vsel %vm2131_vm6, %v4904_v38, %v2710_v6  ;;  %v2804_v2 = vsel %vm2122_vm3, %v2803_v30, %v2802_v21  ;;  %v3034_v21 = vld [vmem:[%s524_s22 + $0x8] sm:$0xff]  ;;  %v3033_v30 = vld [vmem:[%s524_s22] sm:$0xff]  ;;  %s4277_s22 = sshll.u32 %s4340_s17, 4  ;;  %s4278_s22 = int_to_ptr.vmem [resolvable:$false] %s4277_s22 }
 0x341   : > { %v2812_v19 = vrot.slane %v4957_v52, 7  ;;  %v2816_v58 = vsel %vm2119_vm2, %v2815_v31, %v2814_v15  ;;  %v2713_v59 = vsel %vm2134_vm7, %v2712_v13, %v2711_v17  ;;  %v2806_v8 = vsel %vm2125_vm4, %v2805_v18, %v2804_v2  ;;  %s4279_s26 = scalar_lea.vmem %s4278_s22, 32  ;;  %p4280_p0 = scmp.lt.s32.totalorder %s5464_s20, %s4278_s22 }
 0x342   : > { %v2818_v10 = vsel %vm2122_vm3, %v2817_v48, %v2816_v58  ;;  %v2819_v20 = vrot.slane %v4861_v54, 3  ;;  %v2715_v22 = vsel %vm2137_vm8, %v2714_v3, %v2713_v59  ;;  %v2808_v11 = vsel %vm2128_vm5, %v2807_v45, %v2806_v8  ;;  %p4281_p1 = scmp.lt.s32.totalorder %s4279_s26, %s4273_s19 }
 0x343   : > { %v2821_v51 = vrot.slane %v4884_v26, 2  ;;  %v2823_v36 = vrot.slane %v4904_v38, 1  ;;  %v2810_v15 = vsel %vm2131_vm6, %v2809_v41, %v2808_v11  ;;  %v2826_v50 = vrot.slane %v4949_v27, 7 }
 0x344   : > { %3877 = vmatmul.mubr.msk.f32.vlgmr.msra.gmra.mrb[16].mxu0 %vm573_vm0, %v4970_v62  ;;  %v2820_v31 = vsel %vm2125_vm4, %v2819_v20, %v2818_v10  ;;  %v2914_v48 = vsel %vm2119_vm2, %v2913_v40, %v2912_v25  ;;  %v2811_v62 = vsel %vm2134_vm7, %v4931_v32, %v2810_v15  ;;  %v2915_v7 = vrot.slane %v4848_v12, 5  ;;  %v3576_v40 = vld [vmem:[%s5508_s4 + $0x50] sm:$0xff]  ;;  %v3577_v12 = vld [vmem:[%s5508_s4 + $0x58] sm:$0xff]  ;;  %v3086_v10 = vld [vmem:[%s5512_s8 + $0x8] sm:$0xff]  ;;  %p4282_p2 = por %p4281_p1, %p4280_p0 }
 0x345   : > { %4044 = vmatpush3.bf16.msra.mxu0 %v4804_v4  ;;  %3883 = vmatprep.mubr.msk.f32.mxu0 %vm573_vm0, %v4978_v0  ;;  %v2822_v56 = vsel %vm2128_vm5, %v2821_v51, %v2820_v31  ;;  %v2917_v28 = vrot.slane %v4868_v55, 4  ;;  %v2813_v9 = vsel %vm2137_vm8, %v2812_v19, %v2811_v62  ;;  %v2919_v4 = vrot.slane %v4890_v44, 3  ;;  %v3088_v20 = vld [vmem:[%s5512_s8 + $0x18] sm:$0xff]  ;;  %v3087_v51 = vld [vmem:[%s5512_s8 + $0x10] sm:$0xff]  ;;  %v3089_v62 = vld [vmem:[%s5512_s8 + $0x20] sm:$0xff] }
 0x346   : > { %4046 = vmatprep.subr.bf16.mxu0 %v4806_v5  ;;  %v2824_v25 = vsel %vm2131_vm6, %v2823_v36, %v2822_v56  ;;  %v2921_v61 = vrot.slane %v4910_v63, 2  ;;  %v2916_v0 = vsel %vm2122_vm3, %v2915_v7, %v2914_v48  ;;  %v2923_v24 = vrot.slane %v4931_v32, 1  ;;  %v3090_v36 = vld [vmem:[%s5512_s8 + $0x28] sm:$0xff]  ;;  %v3092_v15 = vld [vmem:[%s5512_s8 + $0x38] sm:$0xff]  ;;  %v3091_v56 = vld [vmem:[%s5512_s8 + $0x30] sm:$0xff]  ;;  %p4283_p3 = pnand %p4282_p2, %p4276_p13 }
 0x347   : > { %v2825_v55 = vsel %vm2134_vm7, %v4925_v53, %v2824_v25  ;;  %v2928_v44 = vsel %vm2119_vm2, %v2927_v33, %v2926_v16  ;;  %v2918_v39 = vsel %vm2125_vm4, %v2917_v28, %v2916_v0  ;;  %v2931_v57 = vrot.slane %v4861_v54, 4  ;;  %v3094_v7 = vld [vmem:[%s5512_s8 + $0x48] sm:$0xff]  ;;  %v3096_v28 = vld [vmem:[%s5512_s8 + $0x58] sm:$0xff] }
 0x348   : > { %v2827_v63 = vsel %vm2137_vm8, %v2826_v50, %v2825_v55  ;;  %v2930_v37 = vsel %vm2122_vm3, %v2929_v49, %v2928_v44  ;;  %v2920_v34 = vsel %vm2128_vm5, %v2919_v4, %v2918_v39  ;;  %v2933_v32 = vrot.slane %v4884_v26, 3  ;;  %v3093_v4 = vld [vmem:[%s5512_s8 + $0x40] sm:$0xff]  ;;  %v3099_v44 = vld [vmem:[%s5512_s8 + $0x70] sm:$0xff]  ;;  %v3104_v39 = vld [vmem:[%s5512_s8 + $0x98] sm:$0xff] }
 0x349   : > { %v2935_v1 = vrot.slane %v4904_v38, 2  ;;  %v2937_v14 = vrot.slane %v4925_v53, 1  ;;  %v4049_v43 = vpack.c.bf16 %v3577_v12, %v3576_v40  ;;  %v2922_v16 = vsel %vm2131_vm6, %v2921_v61, %v2920_v34  ;;  %v3580_v53 = vld [vmem:[%s5508_s4 + $0x60] sm:$0xff]  ;;  %v3095_v61 = vld [vmem:[%s5512_s8 + $0x50] sm:$0xff]  ;;  %v3098_v40 = vld [vmem:[%s5512_s8 + $0x68] sm:$0xff] }
 0x34a   : > { %v2932_v33 = vsel %vm2125_vm4, %v2931_v57, %v2930_v37  ;;  %v2924_v13 = vsel %vm2134_vm7, %v2923_v24, %v2922_v16  ;;  %v4061_v11 = vpack.c.bf16 %v3088_v20, %v3086_v10  ;;  %v4337_v31 = vmov 0.0   ;;  %v3100_v12 = vld [vmem:[%s5512_s8 + $0x78] sm:$0xff]  ;;  %v3097_v24 = vld [vmem:[%s5512_s8 + $0x60] sm:$0xff]  ;;  %v3224_v10 = vld [vmem:[%s5514_s10 + $0xb0] sm:$0xff] }
 0x34b   : > { %v2934_v42 = vsel %vm2128_vm5, %v2933_v32, %v2932_v33  ;;  %v2925_v49 = vsel %vm2137_vm8, %v4957_v52, %v2924_v13  ;;  %v3581_v52 = vld [vmem:[%s5508_s4 + $0x68] sm:$0xff]  ;;  %3193 = vmatprep.mubr.f32.mxu1 %v4337_v31  ;;  %v4065_v48 = vpack.c.bf16 %v3092_v15, %v3090_v36  ;;  %v4069_v25 = vpack.c.bf16 %v3096_v28, %v3094_v7  ;;  %v3101_v34 = vld [vmem:[%s5512_s8 + $0x80] sm:$0xff]  ;;  %v3103_v32 = vld [vmem:[%s5512_s8 + $0x90] sm:$0xff] }
 0x34c   : > { %3884 = vmatmul.mubr.msk.f32.vlgmr.msra.gmra.mrb[16].mxu0 %vm573_vm0, %v5016_v29  ;;  %v2936_v54 = vsel %vm2131_vm6, %v2935_v1, %v2934_v42  ;;  %v4053_v29 = vpack.c.bf16 %v3581_v52, %v3580_v53  ;;  %4062 = vmatprep.subr.bf16.mxu1 %v4061_v11  ;;  %v4071_v55 = vpack.c.bf16 %v3095_v61, %v3093_v4  ;;  %v3106_v1 = vld [vmem:[%s5512_s8 + $0xa8] sm:$0xff]  ;;  %v3105_v16 = vld [vmem:[%s5512_s8 + $0xa0] sm:$0xff]  ;;  %v3107_v13 = vld [vmem:[%s5512_s8 + $0xb0] sm:$0xff] }
 0x34d   : > { %4048 = vmatpush3.bf16.msra.mxu0 %v4806_v5  ;;  %3890 = vmatprep.mubr.msk.f32.mxu0 %vm573_vm0, %v5036_v35  ;;  %v2938_v26 = vsel %vm2134_vm7, %v2937_v14, %v2936_v54  ;;  %v3584_v5 = vld [vmem:[%s5508_s4 + $0x70] sm:$0xff]  ;;  %v4073_v0 = vpack.c.bf16 %v3100_v12, %v3098_v40  ;;  %v4075_v37 = vpack.c.bf16 %v3099_v44, %v3097_v24  ;;  %v3108_v14 = vld [vmem:[%s5512_s8 + $0xb8] sm:$0xff]  ;;  %v3110_v42 = vld [vmem:[%s5512_s8 + $0xc8] sm:$0xff] }
 0x34e   : > { %4050 = vmatprep.subr.bf16.mxu0 %v4049_v43  ;;  %v2939_v38 = vsel %vm2137_vm8, %v4949_v27, %v2938_v26  ;;  %v3585_v27 = vld [vmem:[%s5508_s4 + $0x78] sm:$0xff]  ;;  %v4081_v33 = vpack.c.bf16 %v3108_v14, %v3106_v1  ;;  %v3218_v54 = vld [vmem:[%s5514_s10 + $0x80] sm:$0xff]  ;;  %v3219_v26 = vld [vmem:[%s5514_s10 + $0x88] sm:$0xff] }
 0x34f   : > { %v4057_v35 = vpack.c.bf16 %v3585_v27, %v3584_v5  ;;  %v4093_v53 = vpack.c.bf16 %v3219_v26, %v3218_v54  ;;  %v3203_v52 = vld [vmem:[%s5514_s10 + $0x8] sm:$0xff]  ;;  %v3221_v5 = vld [vmem:[%s5514_s10 + $0x98] sm:$0xff]  ;;  %v4083_v27 = vpack.c.bf16 %v3107_v13, %v3105_v16  ;;  %v3113_v11 = vld [vmem:[%s5512_s8 + $0xe0] sm:$0xff] }
 0x350   : > { %v3225_v20 = vld [vmem:[%s5514_s10 + $0xb8] sm:$0xff]  ;;  %v3227_v7 = vld [vmem:[%s5514_s10 + $0xc8] sm:$0xff]  ;;  %v3228_v61 = vld [vmem:[%s5514_s10 + $0xd0] sm:$0xff] }
 0x351   : > { %v4105_v15 = vpack.c.bf16 %v3225_v20, %v3224_v10  ;;  %v3211_v4 = vld [vmem:[%s5514_s10 + $0x48] sm:$0xff]  ;;  %v3229_v40 = vld [vmem:[%s5514_s10 + $0xd8] sm:$0xff]  ;;  %v3230_v44 = vld [vmem:[%s5514_s10 + $0xe0] sm:$0xff] }
 0x352   : > { %v3213_v24 = vld [vmem:[%s5514_s10 + $0x58] sm:$0xff]  ;;  %v3590_v54 = vld [vmem:[%s5511_s7] ss:$0 sm:$0xff] }
 0x353   : > { %v3309_v10 = vld [vmem:[%s5516_s12 + $0x18] sm:$0xff] }
 0x354   : > { %3891 = vmatmul.mubr.msk.f32.vlgmr.msra.gmra.mrb[16].mxu0 %vm573_vm0, %v5043_v47  ;;  %v3588_v47 = vld [vmem:[%s5509_s5] ss:$0 sm:$0xff] }
 0x355   : > { %4052 = vmatpush3.bf16.msra.mxu0 %v4049_v43  ;;  %3897 = vmatprep.mubr.msk.f32.mxu0 %vm573_vm0, %v5075_v23  ;;  %v4079_v43 = vpack.c.bf16 %v3103_v32, %v3101_v34 }
 0x356   : > { %4054 = vmatprep.subr.bf16.mxu0 %v4053_v29 }
 0x35c   : > { %3898 = vmatmul.mubr.msk.f32.vlgmr.msra.gmra.mrb[16].mxu0 %vm573_vm0, %v2715_v22  ;;  %v3085_v22 = vld [vmem:[%s5512_s8] sm:$0xff] }
 0x35d   : > { %4056 = vmatpush3.bf16.msra.mxu0 %v4053_v29  ;;  %3904 = vmatprep.mubr.msk.f32.mxu0 %vm573_vm0, %v2813_v9  ;;  %v4063_v50 = vpack.c.bf16 %v3087_v51, %v3085_v22  ;;  %v4067_v9 = vpack.c.bf16 %v3091_v56, %v3089_v62  ;;  %v3220_v29 = vld [vmem:[%s5514_s10 + $0x90] sm:$0xff]  ;;  %v3226_v56 = vld [vmem:[%s5514_s10 + $0xc0] sm:$0xff] }
 0x35e   : > { %4058 = vmatprep.subr.bf16.mxu0 %v4057_v35  ;;  %v3115_v51 = vld [vmem:[%s5512_s8 + $0xf0] sm:$0xff] }
 0x35f   : > { %4064 = vmatpush1.bf16.msra.mxu1 %v4063_v50  ;;  %v3208_v50 = vld [vmem:[%s5514_s10 + $0x30] sm:$0xff]  ;;  %v4091_v62 = vpack.c.bf16 %v3115_v51, %v3113_v11  ;;  %v3311_v11 = vld [vmem:[%s5516_s12 + $0x28] sm:$0xff] }
 0x360   : > { %4066 = vmatprep.subr.bf16.mxu1 %v4065_v48  ;;  %v3209_v48 = vld [vmem:[%s5514_s10 + $0x38] sm:$0xff] }
 0x361   : > { %v4107_v28 = vpack.c.bf16 %v3209_v48, %v3208_v50  ;;  %v3314_v48 = vld [vmem:[%s5516_s12 + $0x40] sm:$0xff] }
 0x363   : > { %4068 = vmatpush1.bf16.msra.mxu1 %v4067_v9  ;;  %v4109_v9 = vpack.c.bf16 %v3227_v7, %v3226_v56  ;;  %v3316_v7 = vld [vmem:[%s5516_s12 + $0x50] sm:$0xff] }
 0x364   : > { %3905 = vmatmul.mubr.msk.f32.vlgmr.msra.gmra.mrb[16].mxu0 %vm573_vm0, %v2827_v63  ;;  %4070 = vmatprep.subr.bf16.mxu1 %v4069_v25  ;;  %v3102_v63 = vld [vmem:[%s5512_s8 + $0x88] sm:$0xff]  ;;  %v3210_v25 = vld [vmem:[%s5514_s10 + $0x40] sm:$0xff] }
 0x365   : > { %4060 = vmatpush3.bf16.msra.mxu0 %v4057_v35  ;;  %3911 = vmatprep.mubr.msk.f32.mxu0 %vm573_vm0, %v2925_v49  ;;  %v4077_v57 = vpack.c.bf16 %v3104_v39, %v3102_v63  ;;  %v3112_v49 = vld [vmem:[%s5512_s8 + $0xd8] sm:$0xff]  ;;  %v4111_v12 = vpack.c.bf16 %v3211_v4, %v3210_v25  ;;  %v3231_v63 = vld [vmem:[%s5514_s10 + $0xe8] sm:$0xff]  ;;  %v3119_v25 = vlaneseq }
 0x366   : > { %4094 = vmatprep.subr.bf16.mxu0 %v4093_v53 }
 0x367   : > { %4072 = vmatpush1.bf16.msra.mxu1 %v4071_v55  ;;  %v4113_v55 = vpack.c.bf16 %v3229_v40, %v3228_v61  ;;  %v3120_v4 = vshrl.u32 %v3119_v25, 7  ;;  %v3117_v40 = vld [vmem:[%s5513_s9] sm:$0x3] }
 0x368   : > { %4074 = vmatprep.subr.bf16.mxu1 %v4073_v0  ;;  %v3212_v0 = vld [vmem:[%s5514_s10 + $0x50] sm:$0xff] }
 0x369   : > { %v4115_v39 = vpack.c.bf16 %v3213_v24, %v3212_v0  ;;  %v3121_v61 = vsub.s32 0, %v3120_v4 }
 0x36b   : > { %4076 = vmatpush1.bf16.msra.mxu1 %v4075_v37  ;;  %v4117_v37 = vpack.c.bf16 %v3231_v63, %v3230_v44 }
 0x36c   : > { %3912 = vmatmul.mubr.msk.f32.vlgmr.msra.gmra.mrb[16].mxu0 %vm573_vm0, %v2939_v38  ;;  %4078 = vmatprep.subr.bf16.mxu1 %v4077_v57  ;;  %v3202_v38 = vld [vmem:[%s5514_s10] sm:$0xff] }
 0x36d   : > { %v4095_v35 = vpack.c.bf16 %v3203_v52, %v3202_v38 }
 0x36f   : > { %4080 = vmatpush1.bf16.msra.mxu1 %v4079_v43  ;;  %4096 = vmatpush3.bf16.msra.mxu0 %v4095_v35 }
 0x370   : > { %4082 = vmatprep.subr.bf16.mxu1 %v4081_v33  ;;  %v3589_v33 = vld [vmem:[%s5510_s6] ss:$0 sm:$0xff] }
 0x373   : > { %4084 = vmatpush1.bf16.msra.mxu1 %v4083_v27 }
 0x43f   : > { %v3913_v3 = vpop.f32.mrb[16].mxu0 }
 0x440   : > { %v3032_v46 = vadd.f32 %v3913_v3, %v3588_v47  ;;  %v3013_v60 = vpop.f32.mrb[17].mxu0  ;;  %v3204_v3 = vld [vmem:[%s5514_s10 + $0x10] sm:$0xff] }
 0x441   : > { %v3031_v18 = vadd.f32 %v3588_v47, %v3013_v60  ;;  %v4097_v47 = vpack.c.bf16 %v3221_v5, %v3220_v29  ;;  %v4085_v60 = vpack.c.bf16 %v3112_v49, %v3110_v42 }
 0x442   : > { %v3036_v23 = vadd.f32 %v3034_v21, %v3032_v46  ;;  %v3205_v21 = vld [vmem:[%s5514_s10 + $0x18] sm:$0xff]  ;;  %v3222_v46 = vld [vmem:[%s5514_s10 + $0xa0] sm:$0xff] }
 0x443   : > { %v3035_v6 = vadd.f32 %v3033_v30, %v3031_v18  ;;  %v3109_v30 = vld [vmem:[%s5512_s8 + $0xc0] sm:$0xff]  ;;  %v3111_v18 = vld [vmem:[%s5512_s8 + $0xd0] sm:$0xff]  ;;  %4098 = vmatprep.subr.bf16.mxu0 %v4097_v47  ;;  %4086 = vmatprep.subr.bf16.mxu1 %v4085_v60 }
 0x444   : > { %3039 = vadd.xlane.f32.xlu1 %v3036_v23  ;;  %v3232_v60 = vld [vmem:[%s5514_s10 + $0xf0] sm:$0xff] }
 0x445   : > { %3037 = vadd.xlane.f32.xlu0 %v3035_v6 }
 0x4d1   : > { %v3040_v45 = vpop.xlane.xlu1 %3039 }
 0x4d2   : > { %v3043_v41 = vmul.f32 0.0078125, %v3040_v45  ;;  %v3038_v17 = vpop.xlane.xlu0 %3037  ;;  %v3116_v45 = vld [vmem:[%s5512_s8 + $0xf8] sm:$0xff] }
 0x4d3   : > { %v3042_v2 = vmul.f32 0.0078125, %v3038_v17 }
 0x4d4   : > { %v5190_v19 = vsub.f32 %v3036_v23, %v3043_v41  ;;  %v3223_v23 = vld [vmem:[%s5514_s10 + $0xa8] sm:$0xff]  ;;  %v4099_v41 = vpack.c.bf16 %v3205_v21, %v3204_v3 }
 0x4d5   : > { %v5192_v58 = vsub.f32 %v3035_v6, %v3042_v2  ;;  %v3114_v6 = vld [vmem:[%s5512_s8 + $0xe8] sm:$0xff]  ;;  %v4101_v17 = vpack.c.bf16 %v3223_v23, %v3222_v46  ;;  %v3206_v2 = vld [vmem:[%s5514_s10 + $0x20] sm:$0xff] }
 0x4d6   : > { %v3047_v59 = vmul.f32 %v5190_v19, %v5190_v19  ;;  %v4089_v22 = vpack.c.bf16 %v3116_v45, %v3114_v6  ;;  %4100 = vmatpush3.bf16.msra.mxu0 %v4099_v41  ;;  %v3217_v6 = vld [vmem:[%s5514_s10 + $0x78] sm:$0xff]  ;;  %v3306_v41 = vld [vmem:[%s5516_s12] sm:$0xff] }
 0x4d7   : > { %v3046_v8 = vmul.f32 %v5192_v58, %v5192_v58  ;;  %4102 = vmatprep.subr.bf16.mxu0 %v4101_v17  ;;  %v3307_v17 = vld [vmem:[%s5516_s12 + $0x8] sm:$0xff] }
 0x4d8   : > { %3050 = vadd.xlane.f32.xlu1 %v3047_v59  ;;  %v3207_v59 = vld [vmem:[%s5514_s10 + $0x28] sm:$0xff] }
 0x4d9   : > { %3048 = vadd.xlane.f32.xlu0 %v3046_v8  ;;  %v4087_v8 = vpack.c.bf16 %v3111_v18, %v3109_v30  ;;  %v4103_v36 = vpack.c.bf16 %v3207_v59, %v3206_v2  ;;  %v3233_v30 = vld [vmem:[%s5514_s10 + $0xf8] sm:$0xff]  ;;  %v3216_v18 = vld [vmem:[%s5514_s10 + $0x70] sm:$0xff]  ;;  %v4338_v59 = vmov 0.0|0.0  }
 0x4da   : > { %v4121_v23 = vpack.c.bf16 %v3233_v30, %v3232_v60  ;;  %v4123_v45 = vpack.c.bf16 %v3217_v6, %v3216_v18  ;;  %v3308_v2 = vld [vmem:[%s5516_s12 + $0x10] sm:$0xff] }
 0x4db   : > { %4088 = vmatpush1.bf16.msra.mxu1 %v4087_v8  ;;  %4104 = vmatpush3.bf16.msra.mxu0 %v4103_v36  ;;  %v4126_v8 = vpack.c.bf16 %v3307_v17, %v3306_v41  ;;  %v4129_v20 = vpack.c.bf16 %v3309_v10, %v3308_v2  ;;  %v3312_v36 = vld [vmem:[%s5516_s12 + $0x30] sm:$0xff] }
 0x4dc   : > { %4090 = vmatprep.subr.bf16.mxu1 %v4089_v22  ;;  %4106 = vmatprep.subr.bf16.mxu0 %v4105_v15  ;;  %v3310_v22 = vld [vmem:[%s5516_s12 + $0x20] sm:$0xff]  ;;  %v3313_v15 = vld [vmem:[%s5516_s12 + $0x38] sm:$0xff] }
 0x4dd   : > { %v4132_v51 = vpack.c.bf16 %v3311_v11, %v3310_v22  ;;  %v4135_v50 = vpack.c.bf16 %v3313_v15, %v3312_v36 }
 0x4df   : > { %4092 = vmatpush1.bf16.msra.mxu1 %v4091_v62  ;;  %4108 = vmatpush3.bf16.msra.mxu0 %v4107_v28  ;;  %v3315_v62 = vld [vmem:[%s5516_s12 + $0x48] sm:$0xff]  ;;  %v3317_v28 = vld [vmem:[%s5516_s12 + $0x58] sm:$0xff] }
 0x4e0   : > { %4110 = vmatprep.subr.bf16.mxu0 %v4109_v9  ;;  %4125 = vmatprep.subr.bf16.mxu1 %v4338_v59  ;;  %v4138_v56 = vpack.c.bf16 %v3315_v62, %v3314_v48  ;;  %v4141_v9 = vpack.c.bf16 %v3317_v28, %v3316_v7 }
 0x4e3   : > { %4112 = vmatpush3.bf16.msra.mxu0 %v4111_v12  ;;  %v3125_v12 = vsub.s32 1, %v3120_v4 }
 0x4e4   : > { %4114 = vmatprep.subr.bf16.mxu0 %v4113_v55  ;;  %v3122_v55 = vrot.slane %v3117_v40, %v3121_v61 }
 0x4e5   : > { %v3126_v0 = vrot.slane %v3117_v40, %v3125_v12 }
 0x4e7   : > { %4116 = vmatpush3.bf16.msra.mxu0 %v4115_v39 }
 0x4e8   : > { %4118 = vmatprep.subr.bf16.mxu0 %v4117_v37 }
 0x565   : > { %v3051_v57 = vpop.xlane.xlu1 %3050 }
 0x566   : > { %v3053_v34 = vmul.f32 0.0078125, %v3051_v57  ;;  %v3049_v32 = vpop.xlane.xlu0 %3048 }
 0x567   : > { %v3052_v1 = vmul.f32 0.0078125, %v3049_v32  ;;  %v3319_v32 = vld [vmem:[%s5516_s12 + $0x68] sm:$0xff] }
 0x568   : > { %v3055_v14 = vadd.f32 1e-05, %v3053_v34  ;;  %v3318_v34 = vld [vmem:[%s5516_s12 + $0x60] sm:$0xff] }
 0x569   : > { %v3054_v43 = vadd.f32 1e-05, %v3052_v1  ;;  %v3320_v1 = vld [vmem:[%s5516_s12 + $0x70] sm:$0xff] }
 0x56a   : > { %4269 = vrsqrt.f32 %v3055_v14  ;;  %v4144_v14 = vpack.c.bf16 %v3319_v32, %v3318_v34 }
 0x56b   : > { %4271 = vrsqrt.f32 %v3054_v43  ;;  %v3321_v43 = vld [vmem:[%s5516_s12 + $0x78] sm:$0xff] }
 0x574   : > { %v4270_v16 = vpop.eup %4269 }
 0x575   : > { %v4272_v13 = vpop.eup %4271  ;;  %v3059_v42 = vmul.f32 %v4270_v16, %v5190_v19  ;;  %v3214_v19 = vld [vmem:[%s5514_s10 + $0x60] sm:$0xff]  ;;  %v4147_v16 = vpack.c.bf16 %v3321_v43, %v3320_v1 }
 0x576   : > { %v3058_v49 = vmul.f32 %v4272_v13, %v5192_v58  ;;  %v3215_v58 = vld [vmem:[%s5514_s10 + $0x68] sm:$0xff]  ;;  %v3234_v13 = vld [vmem:[%s5515_s11] sm:$0x1] }
 0x577   : > { %v3068_v26 = vmul.f32 %v3589_v33, %v3059_v42  ;;  %v4119_v46 = vpack.c.bf16 %v3215_v58, %v3214_v19 }
 0x578   : > { %v3067_v38 = vmul.f32 %v3589_v33, %v3058_v49 }
 0x579   : > { %v3077_v53 = vadd.f32 %v3590_v54, %v3068_v26  ;;  %4120 = vmatpush3.bf16.msra.mxu0 %v4119_v46 }
 0x57a   : > { %v3076_v52 = vadd.f32 %v3590_v54, %v3067_v38  ;;  %4122 = vmatprep.subr.bf16.mxu0 %v4121_v23 }
 0x57c   : > { %v3078_v29 = vadd.f32 %v3077_v53, %v3076_v52 }
 0x57d   : > { %4124 = vmatpush3.bf16.msra.mxu0 %v4123_v45 }
 0x57e   : > { %v3079_v5 = vrot.slane %v3078_v29, 4 }
 0x580   : > { %v3080_v27 = vadd.f32 %v3079_v5, %v3078_v29 }
 0x582   : > { %v3081_v35 = vrot.slane %v3080_v27, 2 }
 0x584   : > { %v3082_v47 = vadd.f32 %v3081_v35, %v3080_v27 }
 0x586   : > { %v3083_v3 = vrot.slane %v3082_v47, 1 }
 0x588   : > { %v3084_v21 = vadd.f32 %v3083_v3, %v3082_v47 }
 0x58a   : > { %3194 = vmatmul.mubr.f32.vlgmr.msra.gmra.mrb[16].mxu1 %v3084_v21 }
 0x58b   : > { %4127 = vmatpush3.bf16.msra.mxu1 %v4126_v8  ;;  %3946 = vmatprep.mubr.msk.f32.mxu1 %vm4339_vm9, %v4337_v31  ;;  %v3322_v31 = vld [vmem:[%s5517_s13] sm:$0x1] }
 0x58c   : > { %4128 = vmatprep.subr.bf16.mxu1 %v4338_v59 }
 0x58f   : > { %4130 = vmatpush3.bf16.msra.mxu1 %v4129_v20 }
 0x590   : > { %4131 = vmatprep.subr.bf16.mxu1 %v4338_v59 }
 0x593   : > { %4133 = vmatpush3.bf16.msra.mxu1 %v4132_v51 }
 0x594   : > { %4134 = vmatprep.subr.bf16.mxu1 %v4338_v59 }
 0x597   : > { %4136 = vmatpush3.bf16.msra.mxu1 %v4135_v50 }
 0x598   : > { %4137 = vmatprep.subr.bf16.mxu1 %v4338_v59 }
 0x59b   : > { %4139 = vmatpush3.bf16.msra.mxu1 %v4138_v56 }
 0x59c   : > { %4140 = vmatprep.subr.bf16.mxu1 %v4338_v59 }
 0x59f   : > { %4142 = vmatpush3.bf16.msra.mxu1 %v4141_v9 }
 0x5a0   : > { %4143 = vmatprep.subr.bf16.mxu1 %v4338_v59 }
 0x5a3   : > { %4145 = vmatpush3.bf16.msra.mxu1 %v4144_v14 }
 0x5a4   : > { %4146 = vmatprep.subr.bf16.mxu1 %v4338_v59 }
 0x5a7   : > { %4148 = vmatpush3.bf16.msra.mxu1 %v4147_v16 }
 0x65d   : > { %v3195_v24 = vpop.f32.mrb[16].mxu1 }
 0x65e   : > { %v3196_v44 = vadd.f32 %v3195_v24, %v3122_v55  ;;  %v3197_v63 = vpop.f32.mrb[17].mxu1 }
 0x65f   : > { %v3198_v39 = vadd.f32 %v3197_v63, %v3126_v0 }
 0x660   : > { %v3200_v57 = vmax.f32 %v3196_v44, 0.0 }
 0x661   : > { %v3201_v37 = vmax.f32 %v3198_v39, 0.0 }
 0x663   : > { %3299 = vmatprep.mubr.f32.mxu0 %v3201_v37 }
 0x664   : > { %3300 = vmatmul.mubr.f32.vlgmr.msra.gmra.mrb[18].mxu0 %v3200_v57 }
 0x737   : > { %v3726_v33 = vpop.f32.mrb[18].mxu0 }
 0x738   : > { %v3727_v42 = vpop.f32.mrb[19].mxu0 }
 0x739   : > { %v3728_v49 = vadd.f32 %v3727_v42, %v3726_v33 }
 0x73b   : > { %v3302_v54 = vadd.f32 %v3728_v49, %v3234_v13 }
 0x73d   : > { %v3305_v26 = vmax.f32 %v3302_v54, 0.0 }
 0x73f   : > { %3947 = vmatmul.mubr.f32.vlgmr.msra.gmra.mrb[18].mxu1 %v3305_v26 }
 0x812   : > { %v3389_v38 = vpop.f32.mrb[18].mxu1 }
 0x813   : > { %v3390_v53 = vadd.f32 %v3389_v38, %v3322_v31  ;;  %v3948_v52 = vpop.f32.mrb[19].mxu1 }
 0x815   : > { %3393 = vst [vmem:[%s504_s18] sm:$0x1] %v3390_v53 }
 0x816   : > { %4286 = shalt.err (!%p4283_p3)
}
 0x817   : > { %s4287_s21 = scalar_lea.hbm %s5462_s2, 16  ;;  %s4291_s28 = scalar_lea.hbm %s5518_s14, 32 }
 0x818   : > { %p4288_p4 = scmp.ne.s32.totalorder %s5462_s2, %s4287_s21  ;;  %p4292_p9 = scmp.lt.u32.totalorder %s5462_s2, %s5518_s14 }
 0x819   : > { %p4293_p10 = scmp.lt.u32.totalorder %s4291_s28, %s4287_s21  ;;  %p4295_p12 = scmp.lt.u32.totalorder %s4287_s21, %s5462_s2 }
 0x81a   : > { %p4289_p7 = pnand %p4288_p4, %p4454_p5 }
 0x81b   : > { %p4294_p11 = por %p4293_p10, %p4292_p9 }
 0x81c   : > { %p4290_p8 = pneg %p4289_p7 }
 0x81d   : > { %p4296_p13 = por %p4295_p12, %p4294_p11 }
 0x81f   : > { %p4297_p0 = pnand %p4296_p13, %p4290_p8 }
 0x821   : > { %4300 = shalt.err (!%p4297_p0)
}
 0x822   : > { %4163 = dma.vmem_to_hbm [thread:$0]  (%p4454_p5), %s5464_s20, 16, %s5462_s2, %s3395_s15  }
 0x823 PF: > { %p4169_p1 = scmp.ge.s32.totalorder %s4335_s16, 2  ;;  %s3419_s1 = sand.u32 1, %s4323_s29  }
 0x824   : > { %s3420_s19 = scalar_lea.sflag [#allocation3], %s3419_s1 }
 0x825   : > { %p4166_p2 = pnand %p4169_p1, %p4458_p6 }
 0x827   : > { %4318 = dma.done.wait (!%p4166_p2), %s3420_s19, 16  }
 0x828   : > { %4320 = vsyncadd (!%p4166_p2), %s3420_s19, 4294967280  ;;  %s5535_s16 = sld [smem:[#allocation6_spill]]  ;;  %s5536_s17 = sld [smem:[#allocation5_spill]] }
 0x829   : > { %s5537_s15 = sld [smem:[#allocation7_spill]]  ;;  %s5538_s29 = smov %s4327_s30 }
 0x82e   : > { %p24_p3 = scmp.ge.s32.totalorder %s5535_s16, 4   ;;  %s5539_s30 = smov %s5536_s17 }
 0x830   :  { %26 = sbr.rel (!%p24_p3) target bundleno = 7 (0x7), region = 127 }
 0x837   :  { %3424 = vsyncpa [#allocation3], 1 }
 0x838   :  { %3426 = vsyncpa [#allocation3 + $0x1], 1 }

</bundles_post_ra>
